<compile_context>
chip_gen: v5e
topology: v5e:2x2
jax: 0.10.0
libtpu: 0.0.40
codegen_flags: <defaults>
</compile_context>

<pallas_src>
import functools
import math

import jax
import jax.numpy as jnp
import numpy as np
from jax.experimental import pallas as pl
from jax.experimental.pallas import tpu as pltpu


def _upsample_conv3x3_kernel(x_ref, w_ref, b_ref, o_ref, *,
                             H, W, Cin, Cout, TH, compute_dtype):
    """One (batch, row-tile) step: input rows [h0, h0+TH) -> output rows [2h0, 2h0+2TH).

    x_ref : (1, H, W, Cin)         full input image for this batch (resident across t)
    w_ref : (Cin, 12*Cout)         [A0 A1 A2 | B0 B1 B2 | C0 C1 C2 | D0 D1 D2] where
                                   A=w[ky0], B=w[ky1]+w[ky2], C=w[ky0]+w[ky1], D=w[ky2]
                                   per column tap kx (upsample row-duplication pre-folded)
    b_ref : (1, Cout)              fp32 bias
    o_ref : (1, TH, 2, W, 2*Cout)  o[0, j, dr, b, s*Cout+co] = out[2*(h0+j)+dr, 2b+s, co]
    """
    t = pl.program_id(1)
    h0 = t * TH
    M = TH * W

    # ---- extended input tile: input rows [h0-1, h0+TH], out-of-range rows zeroed ----
    mid = x_ref[0, pl.ds(h0, TH)]                                   # (TH, W, Cin)
    prev = x_ref[0, pl.ds(jnp.maximum(h0 - 1, 0), 1)]               # (1, W, Cin)
    prev = prev * (h0 > 0).astype(prev.dtype)                       # conv zero-pad (top)
    nxt = x_ref[0, pl.ds(jnp.minimum(h0 + TH, H - 1), 1)]           # (1, W, Cin)
    nxt = nxt * (h0 + TH < H).astype(nxt.dtype)                     # conv zero-pad (bottom)
    xe = jnp.concatenate([prev, mid, nxt], axis=0)                  # (TH+2, W, Cin)
    xe = xe.reshape((TH + 2) * W, Cin).astype(compute_dtype)

    # ---- ONE MXU matmul at INPUT resolution, fp32 accumulation ----
    y = jnp.dot(xe, w_ref[...], preferred_element_type=jnp.float32)  # ((TH+2)*W, 12*Cout)

    # Row-tap shifts are static slices of the extended result:
    #   even output row 2h   :  x[h-1] @ A  +  x[h]   @ B
    #   odd  output row 2h+1 :  x[h]   @ C  +  x[h+1] @ D
    ev = y[0:M, 0 * Cout:3 * Cout] + y[W:W + M, 3 * Cout:6 * Cout]            # (M, 3*Cout)
    od = y[W:W + M, 6 * Cout:9 * Cout] + y[2 * W:2 * W + M, 9 * Cout:12 * Cout]

    # ---- column taps: even out col 2b needs kx0 at b-1; odd col 2b+1 needs kx2 at b+1
    bias = b_ref[...]                                               # (1, Cout) fp32
    col = jax.lax.broadcasted_iota(jnp.int32, (M, 1), 0) % W        # (M, 1) lane-thin mask
    first_col = col == 0
    last_col = col == W - 1

    def col_combine(taps):
        t0 = taps[:, 0 * Cout:1 * Cout]
        t1b = taps[:, 1 * Cout:2 * Cout] + bias                     # bias folded once
        t2 = taps[:, 2 * Cout:3 * Cout]
        t0m = jnp.where(first_col, 0.0, pltpu.roll(t0, shift=1, axis=0))      # t0 at b-1
        t2m = jnp.where(last_col, 0.0, pltpu.roll(t2, shift=M - 1, axis=0))   # t2 at b+1
        return t0m + t1b + t2, t0 + t1b + t2m                       # out cols 2b, 2b+1

    ee, eo = col_combine(ev)     # even output rows
    oe, oo = col_combine(od)     # odd output rows

    # ---- direct, lane/sublane-aligned stores (no concat-then-store temp) ----
    dt = o_ref.dtype
    o_ref[0, :, 0, :, 0:Cout] = ee.reshape(TH, W, Cout).astype(dt)
    o_ref[0, :, 0, :, Cout:2 * Cout] = eo.reshape(TH, W, Cout).astype(dt)
    o_ref[0, :, 1, :, 0:Cout] = oe.reshape(TH, W, Cout).astype(dt)
    o_ref[0, :, 1, :, Cout:2 * Cout] = oo.reshape(TH, W, Cout).astype(dt)


def _pick_row_tile(H, W, target_out_rows=1024):
    """Largest tile of input rows such that ~2*TH*W output rows are produced per step
    (512-1024-row chunks per the perf review) and TH divides H."""
    th = min(H, max(8, target_out_rows // (2 * W)))
    th = max(1, th)
    while H % th:
        th -= 1
    return th


def upsample_forward(params, x, temb=None, *, data_format="NCHW",
                     compute_dtype=jnp.bfloat16, out_dtype=None, row_tile=None):
    """UpSample.forward.

    data_format="NCHW" matches the PyTorch module (entry/exit transposes);
    data_format="NHWC" skips both boundary transposes (preferred when the surrounding
    model is NHWC).  Output dtype defaults to compute_dtype (bf16) to halve the
    dominant HBM write; pass out_dtype=jnp.float32 for a full-precision result.
    """
    del temb  # the PyTorch module ignores temb
    w, b = params["w"], params["b"]                  # w: (3,3,Cin,Cout) HWIO, b: (Cout,)
    if data_format == "NCHW":
        B, Cin, H, W = x.shape
        # transpose + cast fuse into one XLA pass; kernel then reads compute_dtype
        x_nhwc = jnp.transpose(x, (0, 2, 3, 1)).astype(compute_dtype)
    elif data_format == "NHWC":
        B, H, W, Cin = x.shape
        x_nhwc = x                                   # no extra HBM pass; kernel casts the tile
    else:
        raise ValueError(f"unknown data_format {data_format!r}")
    Cout = w.shape[-1]
    out_dtype = compute_dtype if out_dtype is None else out_dtype

    # TODO(synk): pad/pack small channel counts; diffusion UNets use 128-multiple channels.
    assert Cin % 128 == 0 and Cout % 128 == 0, "kernel assumes lane-aligned channel counts"
    min_w = 16 if np.dtype(compute_dtype).itemsize == 2 else 8
    assert W % min_w == 0, f"W must be a multiple of {min_w} for compute_dtype={compute_dtype}"

    TH = _pick_row_tile(H, W) if row_tile is None else row_tile
    assert H % TH == 0, "row_tile must divide H"

    # Fold the nearest-2x row duplication into 4 combined row-tap matrices:
    #   A = w[0]        (even out row, input row h-1)    B = w[1]+w[2]  (even, row h)
    #   C = w[0]+w[1]   (odd  out row, input row h)      D = w[2]       (odd,  row h+1)
    # each laid out (Cin, 3*Cout) over the 3 column taps -> (Cin, 12*Cout).
    wf = w.astype(jnp.float32)
    packs = [wf[0], wf[1] + wf[2], wf[0] + wf[1], wf[2]]             # each (3, Cin, Cout)
    wbig = jnp.concatenate(
        [jnp.transpose(p, (1, 0, 2)).reshape(Cin, 3 * Cout) for p in packs],
        axis=1).astype(compute_dtype)                                # (Cin, 12*Cout)
    b2 = b.reshape(1, Cout).astype(jnp.float32)

    kernel = functools.partial(_upsample_conv3x3_kernel, H=H, W=W, Cin=Cin,
                               Cout=Cout, TH=TH, compute_dtype=compute_dtype)
    out5 = pl.pallas_call(
        kernel,
        out_shape=jax.ShapeDtypeStruct((B, H, 2, W, 2 * Cout), out_dtype),
        grid=(B, H // TH),
        in_specs=[
            # full per-batch image resident across the row-tile axis (sliced in-kernel);
            # TODO(synk): for very large H*W, switch to a haloed row-window index_map.
            pl.BlockSpec((1, H, W, Cin), lambda n, t: (n, 0, 0, 0)),
            pl.BlockSpec((Cin, 12 * Cout), lambda n, t: (0, 0)),
            pl.BlockSpec((1, Cout), lambda n, t: (0, 0)),
        ],
        out_specs=pl.BlockSpec((1, TH, 2, W, 2 * Cout), lambda n, t: (n, t, 0, 0, 0)),
        compiler_params=pltpu.CompilerParams(
            dimension_semantics=("parallel", "parallel"),   # v7x: both TCs fed even at B=1
            vmem_limit_bytes=48 * 1024 * 1024),
    )(x_nhwc, wbig, b2)

    # free row-major reinterpretation: (B, H, 2, W, 2*Cout) -> (B, 2H, 2W, Cout)
    out_nhwc = out5.reshape(B, 2 * H, 2 * W, Cout)
    if data_format == "NHWC":
        return out_nhwc
    # TODO(synk): this exit transpose re-reads/writes the full output in HBM; keep the
    #             surrounding model NHWC (data_format="NHWC") to avoid it.
    return jnp.transpose(out_nhwc, (0, 3, 1, 2))


# ----------------------------- parameters & reference -----------------------------

def init_upsample_params(key, in_ch):
    # matches nn.Conv2d(in_ch, in_ch, 3) with xavier_uniform_ weight, zero bias
    fan = in_ch * 9
    a = math.sqrt(6.0 / (fan + fan))
    w = jax.random.uniform(key, (3, 3, in_ch, in_ch), jnp.float32, -a, a)   # HWIO
    b = jnp.zeros((in_ch,), jnp.float32)
    return {"w": w, "b": b}


def ref_forward(params, x_nchw, temb=None):
    # pure-JAX fp32 reference: nearest 2x upsample + SAME 3x3 conv (pad=1)
    w, b = params["w"], params["b"]
    x = jnp.transpose(x_nchw, (0, 2, 3, 1))                                  # NHWC
    up = jnp.repeat(jnp.repeat(x, 2, axis=1), 2, axis=2)
    y = jax.lax.conv_general_dilated(up, w, (1, 1), "SAME",
                                     dimension_numbers=("NHWC", "HWIO", "NHWC"),
                                     precision=jax.lax.Precision.HIGHEST)
    y = y + b.reshape(1, 1, 1, -1)
    return jnp.transpose(y, (0, 3, 1, 2))


# ----------------------------- main -----------------------------

if __name__ == "__main__":
    B, C, H, W = 2, 128, 16, 16          # small but lane-dense (C multiple of 128)
    key = jax.random.PRNGKey(0)
    kx, kt, kp = jax.random.split(key, 3)
    x = jax.random.normal(kx, (B, C, H, W), jnp.float32)       # NCHW, like PyTorch
    temb = jax.random.normal(kt, (B, 4 * C), jnp.float32)      # unused by the module
    params = init_upsample_params(kp, C)

    ref = np.asarray(ref_forward(params, x, temb))

    # exact fp32 MXU path with an explicit multi-tile grid (grid = (2, 2)) -> tight check
    out_f32 = jax.block_until_ready(
        upsample_forward(params, x, temb, compute_dtype=jnp.float32,
                         out_dtype=jnp.float32, row_tile=8))
    assert out_f32.shape == (B, C, 2 * H, 2 * W)
    np.testing.assert_allclose(np.asarray(out_f32), ref, atol=2e-3, rtol=2e-3)

    # default perf path: bf16 matmul operands + bf16 output (fp32 accumulation), auto tile
    out_bf16 = jax.block_until_ready(upsample_forward(params, x, temb))
    assert out_bf16.shape == (B, C, 2 * H, 2 * W) and out_bf16.dtype == jnp.bfloat16
    np.testing.assert_allclose(np.asarray(out_bf16.astype(jnp.float32)), ref,
                               atol=1e-1, rtol=1e-1)

    # NHWC fast path (no boundary transposes at all)
    x_nhwc = jnp.transpose(x, (0, 2, 3, 1))
    out_nhwc = jax.block_until_ready(
        upsample_forward(params, x_nhwc, temb, data_format="NHWC"))
    assert out_nhwc.shape == (B, 2 * H, 2 * W, C)
    np.testing.assert_allclose(
        np.asarray(jnp.transpose(out_nhwc, (0, 3, 1, 2)).astype(jnp.float32)), ref,
        atol=1e-1, rtol=1e-1)

    print("KERNEL_OK")
</pallas_src>

<mosaic_0001>
module attributes {stable_mosaic.version = 11 : i64} {
  func.func @_upsample_conv3x3_kernel(%arg0: i32, %arg1: i32, %arg2: memref<1x16x16x128xf32, #tpu.memory_space<vmem>>, %arg3: memref<128x1536xf32, #tpu.memory_space<vmem>>, %arg4: memref<1x128xf32, #tpu.memory_space<vmem>>, %arg5: memref<1x8x2x16x256xf32, #tpu.memory_space<vmem>>) attributes {dimension_semantics = [#tpu.dimension_semantics<parallel>, #tpu.dimension_semantics<parallel>], iteration_bounds = array<i64: 2, 2>, scalar_prefetch = 0 : i64, scratch_operands = 0 : i64, tpu.core_type = #tpu.core_type<tc>, window_params = [{transform_indices = @transform_0, window_bounds = array<i64: 1, 16, 16, 128>}, {pipeline_mode = #tpu.pipeline_mode<synchronous>, transform_indices = @transform_1, window_bounds = array<i64: 128, 1536>}, {pipeline_mode = #tpu.pipeline_mode<synchronous>, transform_indices = @transform_2, window_bounds = array<i64: 1, 128>}, {transform_indices = @transform_3, window_bounds = array<i64: 1, 8, 2, 16, 256>}]} {
    %c8_i32 = arith.constant 8 : i32
    %0 = arith.muli %arg1, %c8_i32 : i32
    %c0 = arith.constant 0 : index
    %1 = arith.index_cast %0 : i32 to index
    %c0_0 = arith.constant 0 : index
    %c0_1 = arith.constant 0 : index
    %2 = vector.load %arg2[%c0, %1, %c0_0, %c0_1] : memref<1x16x16x128xf32, #tpu.memory_space<vmem>>, vector<1x8x16x128xf32>
    %3 = vector.shape_cast %2 : vector<1x8x16x128xf32> to vector<8x16x128xf32>
    %c1_i32 = arith.constant 1 : i32
    %4 = arith.subi %0, %c1_i32 : i32
    %c0_i32 = arith.constant 0 : i32
    %5 = arith.maxsi %4, %c0_i32 : i32
    %c0_2 = arith.constant 0 : index
    %6 = arith.index_cast %5 : i32 to index
    %c0_3 = arith.constant 0 : index
    %c0_4 = arith.constant 0 : index
    %7 = vector.load %arg2[%c0_2, %6, %c0_3, %c0_4] : memref<1x16x16x128xf32, #tpu.memory_space<vmem>>, vector<1x1x16x128xf32>
    %8 = vector.shape_cast %7 : vector<1x1x16x128xf32> to vector<1x16x128xf32>
    %c0_i32_5 = arith.constant 0 : i32
    %9 = arith.cmpi sgt, %0, %c0_i32_5 : i32
    %10 = arith.extui %9 : i1 to i32
    %11 = arith.sitofp %10 : i32 to f32
    %12 = vector.broadcast %11 : f32 to vector<1x16x128xf32>
    %13 = arith.mulf %8, %12 : vector<1x16x128xf32>
    %c8_i32_6 = arith.constant 8 : i32
    %14 = arith.addi %0, %c8_i32_6 : i32
    %c15_i32 = arith.constant 15 : i32
    %15 = arith.minsi %14, %c15_i32 : i32
    %c0_7 = arith.constant 0 : index
    %16 = arith.index_cast %15 : i32 to index
    %c0_8 = arith.constant 0 : index
    %c0_9 = arith.constant 0 : index
    %17 = vector.load %arg2[%c0_7, %16, %c0_8, %c0_9] : memref<1x16x16x128xf32, #tpu.memory_space<vmem>>, vector<1x1x16x128xf32>
    %18 = vector.shape_cast %17 : vector<1x1x16x128xf32> to vector<1x16x128xf32>
    %c8_i32_10 = arith.constant 8 : i32
    %19 = arith.addi %0, %c8_i32_10 : i32
    %c16_i32 = arith.constant 16 : i32
    %20 = arith.cmpi slt, %19, %c16_i32 : i32
    %21 = arith.extui %20 : i1 to i32
    %22 = arith.sitofp %21 : i32 to f32
    %23 = vector.broadcast %22 : f32 to vector<1x16x128xf32>
    %24 = arith.mulf %18, %23 : vector<1x16x128xf32>
    %25 = tpu.concatenate %13, %3, %24 in 0 : vector<1x16x128xf32>, vector<8x16x128xf32>, vector<1x16x128xf32> -> vector<10x16x128xf32>
    %26 = vector.shape_cast %25 : vector<10x16x128xf32> to vector<160x128xf32>
    %c0_11 = arith.constant 0 : index
    %c0_12 = arith.constant 0 : index
    %27 = vector.load %arg3[%c0_11, %c0_12] : memref<128x1536xf32, #tpu.memory_space<vmem>>, vector<128x1536xf32>
    %cst = arith.constant dense<0.000000e+00> : vector<160x1536xf32>
    %28 = tpu.matmul %26, %27, %cst {dimension_numbers = #tpu.dot_dimension_numbers<[1], [0], [0], [1], [0, 0, 1, 1], [], []>} : vector<160x128xf32>, vector<128x1536xf32>, vector<160x1536xf32> -> vector<160x1536xf32>
    %29 = vector.extract_strided_slice %28 {offsets = [0, 0], sizes = [128, 384], strides = [1, 1]} : vector<160x1536xf32> to vector<128x384xf32>
    %30 = vector.extract_strided_slice %28 {offsets = [16, 384], sizes = [128, 384], strides = [1, 1]} : vector<160x1536xf32> to vector<128x384xf32>
    %31 = arith.addf %29, %30 : vector<128x384xf32>
    %32 = vector.extract_strided_slice %28 {offsets = [16, 768], sizes = [128, 384], strides = [1, 1]} : vector<160x1536xf32> to vector<128x384xf32>
    %33 = vector.extract_strided_slice %28 {offsets = [32, 1152], sizes = [128, 384], strides = [1, 1]} : vector<160x1536xf32> to vector<128x384xf32>
    %34 = arith.addf %32, %33 : vector<128x384xf32>
    %c0_13 = arith.constant 0 : index
    %c0_14 = arith.constant 0 : index
    %35 = vector.load %arg4[%c0_13, %c0_14] : memref<1x128xf32, #tpu.memory_space<vmem>>, vector<1x128xf32>
    %36 = tpu.iota {dimensions = array<i32: 0>} : vector<128x1xi32>
    %c16_i32_15 = arith.constant 16 : i32
    %c0_i32_16 = arith.constant 0 : i32
    %37 = arith.cmpi eq, %c16_i32_15, %c0_i32_16 : i32
    %c1_i32_17 = arith.constant 1 : i32
    %38 = arith.select %37, %c1_i32_17, %c16_i32_15 : i32
    %39 = vector.broadcast %38 : i32 to vector<128x1xi32>
    %40 = arith.remsi %36, %39 : vector<128x1xi32>
    %c0_i32_18 = arith.constant 0 : i32
    %41 = vector.broadcast %c0_i32_18 : i32 to vector<128x1xi32>
    %42 = arith.cmpi ne, %40, %41 : vector<128x1xi32>
    %c0_i32_19 = arith.constant 0 : i32
    %43 = vector.broadcast %c0_i32_19 : i32 to vector<128x1xi32>
    %44 = arith.cmpi slt, %40, %43 : vector<128x1xi32>
    %c0_i32_20 = arith.constant 0 : i32
    %45 = arith.cmpi slt, %38, %c0_i32_20 : i32
    %46 = vector.broadcast %45 : i1 to vector<128x1xi1>
    %47 = vector.broadcast %46 : vector<128x1xi1> to vector<128x1xi1>
    %48 = arith.xori %44, %47 : vector<128x1xi1>
    %49 = arith.andi %48, %42 : vector<128x1xi1>
    %50 = vector.broadcast %38 : i32 to vector<128x1xi32>
    %51 = arith.addi %40, %50 : vector<128x1xi32>
    %52 = arith.select %49, %51, %40 : vector<128x1xi1>, vector<128x1xi32>
    %c0_i32_21 = arith.constant 0 : i32
    %53 = vector.broadcast %c0_i32_21 : i32 to vector<128x1xi32>
    %54 = arith.cmpi eq, %52, %53 : vector<128x1xi32>
    %c15_i32_22 = arith.constant 15 : i32
    %55 = vector.broadcast %c15_i32_22 : i32 to vector<128x1xi32>
    %56 = arith.cmpi eq, %52, %55 : vector<128x1xi32>
    %57 = vector.extract_strided_slice %31 {offsets = [0, 0], sizes = [128, 128], strides = [1, 1]} : vector<128x384xf32> to vector<128x128xf32>
    %58 = vector.extract_strided_slice %31 {offsets = [0, 128], sizes = [128, 128], strides = [1, 1]} : vector<128x384xf32> to vector<128x128xf32>
    %59 = vector.broadcast %35 : vector<1x128xf32> to vector<128x128xf32>
    %60 = arith.addf %58, %59 : vector<128x128xf32>
    %61 = vector.extract_strided_slice %31 {offsets = [0, 256], sizes = [128, 128], strides = [1, 1]} : vector<128x384xf32> to vector<128x128xf32>
    %c1_i32_23 = arith.constant 1 : i32
    %62 = tpu.dynamic_rotate %57 by %c1_i32_23 dim 0 : vector<128x128xf32>, i32 -> vector<128x128xf32>
    %cst_24 = arith.constant 0.000000e+00 : f32
    %63 = vector.shape_cast %54 : vector<128x1xi1> to vector<128x1xi1>
    %64 = vector.broadcast %63 : vector<128x1xi1> to vector<128x128xi1>
    %65 = vector.broadcast %cst_24 : f32 to vector<128x128xf32>
    %66 = arith.select %64, %65, %62 : vector<128x128xi1>, vector<128x128xf32>
    %c127_i32 = arith.constant 127 : i32
    %67 = tpu.dynamic_rotate %61 by %c127_i32 dim 0 : vector<128x128xf32>, i32 -> vector<128x128xf32>
    %cst_25 = arith.constant 0.000000e+00 : f32
    %68 = vector.shape_cast %56 : vector<128x1xi1> to vector<128x1xi1>
    %69 = vector.broadcast %68 : vector<128x1xi1> to vector<128x128xi1>
    %70 = vector.broadcast %cst_25 : f32 to vector<128x128xf32>
    %71 = arith.select %69, %70, %67 : vector<128x128xi1>, vector<128x128xf32>
    %72 = arith.addf %66, %60 : vector<128x128xf32>
    %73 = arith.addf %72, %61 : vector<128x128xf32>
    %74 = arith.addf %57, %60 : vector<128x128xf32>
    %75 = arith.addf %74, %71 : vector<128x128xf32>
    %76 = vector.extract_strided_slice %34 {offsets = [0, 0], sizes = [128, 128], strides = [1, 1]} : vector<128x384xf32> to vector<128x128xf32>
    %77 = vector.extract_strided_slice %34 {offsets = [0, 128], sizes = [128, 128], strides = [1, 1]} : vector<128x384xf32> to vector<128x128xf32>
    %78 = vector.broadcast %35 : vector<1x128xf32> to vector<128x128xf32>
    %79 = arith.addf %77, %78 : vector<128x128xf32>
    %80 = vector.extract_strided_slice %34 {offsets = [0, 256], sizes = [128, 128], strides = [1, 1]} : vector<128x384xf32> to vector<128x128xf32>
    %c1_i32_26 = arith.constant 1 : i32
    %81 = tpu.dynamic_rotate %76 by %c1_i32_26 dim 0 : vector<128x128xf32>, i32 -> vector<128x128xf32>
    %cst_27 = arith.constant 0.000000e+00 : f32
    %82 = vector.shape_cast %54 : vector<128x1xi1> to vector<128x1xi1>
    %83 = vector.broadcast %82 : vector<128x1xi1> to vector<128x128xi1>
    %84 = vector.broadcast %cst_27 : f32 to vector<128x128xf32>
    %85 = arith.select %83, %84, %81 : vector<128x128xi1>, vector<128x128xf32>
    %c127_i32_28 = arith.constant 127 : i32
    %86 = tpu.dynamic_rotate %80 by %c127_i32_28 dim 0 : vector<128x128xf32>, i32 -> vector<128x128xf32>
    %cst_29 = arith.constant 0.000000e+00 : f32
    %87 = vector.shape_cast %56 : vector<128x1xi1> to vector<128x1xi1>
    %88 = vector.broadcast %87 : vector<128x1xi1> to vector<128x128xi1>
    %89 = vector.broadcast %cst_29 : f32 to vector<128x128xf32>
    %90 = arith.select %88, %89, %86 : vector<128x128xi1>, vector<128x128xf32>
    %91 = arith.addf %85, %79 : vector<128x128xf32>
    %92 = arith.addf %91, %80 : vector<128x128xf32>
    %93 = arith.addf %76, %79 : vector<128x128xf32>
    %94 = arith.addf %93, %90 : vector<128x128xf32>
    %95 = vector.shape_cast %73 : vector<128x128xf32> to vector<8x16x128xf32>
    %c0_30 = arith.constant 0 : index
    %c0_31 = arith.constant 0 : index
    %c0_32 = arith.constant 0 : index
    %c0_33 = arith.constant 0 : index
    %c0_34 = arith.constant 0 : index
    %96 = vector.load %arg5[%c0_30, %c0_31, %c0_32, %c0_33, %c0_34] : memref<1x8x2x16x256xf32, #tpu.memory_space<vmem>>, vector<1x8x1x16x128xf32>
    %97 = vector.shape_cast %96 : vector<1x8x1x16x128xf32> to vector<8x16x128xf32>
    %98 = vector.shape_cast %95 : vector<8x16x128xf32> to vector<1x8x1x16x128xf32>
    tpu.vector_store %arg5[%c0_30, %c0_31, %c0_32, %c0_33, %c0_34], %98 {strides = array<i32>} : memref<1x8x2x16x256xf32, #tpu.memory_space<vmem>>, vector<1x8x1x16x128xf32>,
    %99 = vector.shape_cast %75 : vector<128x128xf32> to vector<8x16x128xf32>
    %c0_35 = arith.constant 0 : index
    %c0_36 = arith.constant 0 : index
    %c0_37 = arith.constant 0 : index
    %c0_38 = arith.constant 0 : index
    %c128 = arith.constant 128 : index
    %100 = vector.load %arg5[%c0_35, %c0_36, %c0_37, %c0_38, %c128] : memref<1x8x2x16x256xf32, #tpu.memory_space<vmem>>, vector<1x8x1x16x128xf32>
    %101 = vector.shape_cast %100 : vector<1x8x1x16x128xf32> to vector<8x16x128xf32>
    %102 = vector.shape_cast %99 : vector<8x16x128xf32> to vector<1x8x1x16x128xf32>
    tpu.vector_store %arg5[%c0_35, %c0_36, %c0_37, %c0_38, %c128], %102 {strides = array<i32>} : memref<1x8x2x16x256xf32, #tpu.memory_space<vmem>>, vector<1x8x1x16x128xf32>,
    %103 = vector.shape_cast %92 : vector<128x128xf32> to vector<8x16x128xf32>
    %c0_39 = arith.constant 0 : index
    %c0_40 = arith.constant 0 : index
    %c1 = arith.constant 1 : index
    %c0_41 = arith.constant 0 : index
    %c0_42 = arith.constant 0 : index
    %104 = vector.load %arg5[%c0_39, %c0_40, %c1, %c0_41, %c0_42] : memref<1x8x2x16x256xf32, #tpu.memory_space<vmem>>, vector<1x8x1x16x128xf32>
    %105 = vector.shape_cast %104 : vector<1x8x1x16x128xf32> to vector<8x16x128xf32>
    %106 = vector.shape_cast %103 : vector<8x16x128xf32> to vector<1x8x1x16x128xf32>
    tpu.vector_store %arg5[%c0_39, %c0_40, %c1, %c0_41, %c0_42], %106 {strides = array<i32>} : memref<1x8x2x16x256xf32, #tpu.memory_space<vmem>>, vector<1x8x1x16x128xf32>,
    %107 = vector.shape_cast %94 : vector<128x128xf32> to vector<8x16x128xf32>
    %c0_43 = arith.constant 0 : index
    %c0_44 = arith.constant 0 : index
    %c1_45 = arith.constant 1 : index
    %c0_46 = arith.constant 0 : index
    %c128_47 = arith.constant 128 : index
    %108 = vector.load %arg5[%c0_43, %c0_44, %c1_45, %c0_46, %c128_47] : memref<1x8x2x16x256xf32, #tpu.memory_space<vmem>>, vector<1x8x1x16x128xf32>
    %109 = vector.shape_cast %108 : vector<1x8x1x16x128xf32> to vector<8x16x128xf32>
    %110 = vector.shape_cast %107 : vector<8x16x128xf32> to vector<1x8x1x16x128xf32>
    tpu.vector_store %arg5[%c0_43, %c0_44, %c1_45, %c0_46, %c128_47], %110 {strides = array<i32>} : memref<1x8x2x16x256xf32, #tpu.memory_space<vmem>>, vector<1x8x1x16x128xf32>,
    return
  }
  func.func @transform_0(%arg0: i32, %arg1: i32) -> (i32, i32, i32, i32) {
    %c0_i32 = arith.constant 0 : i32
    %c0_i32_0 = arith.constant 0 : i32
    %c0_i32_1 = arith.constant 0 : i32
    %c0_i32_2 = arith.constant 0 : i32
    return %arg0, %c0_i32, %c0_i32_0, %c0_i32_1 : i32, i32, i32, i32
  }
  func.func @transform_1(%arg0: i32, %arg1: i32) -> (i32, i32) {
    %c0_i32 = arith.constant 0 : i32
    %c0_i32_0 = arith.constant 0 : i32
    %c0_i32_1 = arith.constant 0 : i32
    return %c0_i32, %c0_i32_0 : i32, i32
  }
  func.func @transform_2(%arg0: i32, %arg1: i32) -> (i32, i32) {
    %c0_i32 = arith.constant 0 : i32
    %c0_i32_0 = arith.constant 0 : i32
    %c0_i32_1 = arith.constant 0 : i32
    return %c0_i32, %c0_i32_0 : i32, i32
  }
  func.func @transform_3(%arg0: i32, %arg1: i32) -> (i32, i32, i32, i32, i32) {
    %c0_i32 = arith.constant 0 : i32
    %c0_i32_0 = arith.constant 0 : i32
    %c0_i32_1 = arith.constant 0 : i32
    %c0_i32_2 = arith.constant 0 : i32
    return %arg0, %arg1, %c0_i32, %c0_i32_0, %c0_i32_1 : i32, i32, i32, i32, i32
  }
}

</mosaic_0001>

<bundles_post_ra>
// kernel: tpu_custom_call.1
= control target key start
LH: loop header
LB: loop body
LE: loop exit
PB: predicated region body
PF: predicated region fallthrough
CT: control target
= control target key end

     0   :  { %s3890_s0 = inlined_call_operand.hbm [shape: f32[2,16,16,128], index: 0, kind: input, shape index: {}]   ;;  %s3891_s1 = inlined_call_operand.hbm [shape: f32[128,1536], index: 1, kind: input, shape index: {}]   ;;  %s3892_s2 = inlined_call_operand.vmem [shape: f32[1,128], index: 2, kind: input, shape index: {}]   ;;  %s3893_s3 = inlined_call_operand.hbm [shape: f32[2,16,2,16,256], index: 3, kind: output, shape index: {}]  }
   0x1   :  { %3927 = sst [smem:[#allocation40_spill]] %s3891_s1 }
   0x2   :  { %3928 = sst [smem:[#allocation41_spill]] %s3893_s3 }
   0x3   :  { %8 = vsyncpa [#allocation3], 0 }
   0x4   :  { %10 = vsyncpa [#allocation3 + $0x1], 0 }
   0x5   :  { %11 = vsyncpa [#allocation6], 0 }
   0x6   :  { %12 = vsyncpa [#allocation4], 0 }
   0x7   :  { %14 = vsyncpa [#allocation4 + $0x1], 0  ;;  %s2693_s12 = smov 0   ;;  %s2695_s13 = smov 0  }
   0x8   :  { %s2697_s14 = smov 0   ;;  %s2699_s15 = smov 0  }
   0x9   :  { %s2701_s16 = smov 0   ;;  %s2703_s17 = smov 0  }
   0xa   :  { %s2705_s18 = smov 0   ;;  %s2707_s19 = smov 0  }
   0xb   :  { %s2709_s20 = smov 0   ;;  %s2711_s21 = smov 0  }
   0xc   :  { %s2713_s22 = smov 0  }
   0xd LB: > { %3929 = sst [smem:[#allocation11_spill]] %s2624_s12  ;;  %s2282_s23 = sadd.s32 4294967295, %s2664_s22   ;;  %s2664_s22 = sphi %s2713_s22, %s20_s22   ;;  %s2660_s21 = sphi %s2711_s21, %s4090_s21   ;;  %s2656_s20 = sphi %s2709_s20, %s4081_s20   ;;  %s2652_s19 = sphi %s2707_s19, %s4089_s19   ;;  %s2648_s18 = sphi %s2705_s18, %s4080_s18   ;;  %s2644_s17 = sphi %s2703_s17, %s4088_s17   ;;  %s2640_s16 = sphi %s2701_s16, %s4087_s16   ;;  %s2636_s15 = sphi %s2699_s15, %s4086_s15   ;;  %s2632_s14 = sphi %s2697_s14, %s4085_s14   ;;  %s2628_s13 = sphi %s2695_s13, %s4084_s13   ;;  %s2624_s12 = sphi %s2693_s12, %s4083_s12  }
   0xe   : > { %3930 = sst [smem:[#allocation12_spill]] %s2656_s20  ;;  %s2283_s24 = sadd.s32 4294967294, %s2664_s22  }
   0xf   : > { %p52_p0 = scmp.ne.s32.totalorder %s2640_s16, %s2636_s15  ;;  %p2749_p1 = scmp.eq.s32.totalorder %s2282_s23, 0 }
  0x10   : > { %p119_p2 = scmp.ne.s32.totalorder %s2632_s14, %s2628_s13  ;;  %p120_p3 = scmp.eq.s32.totalorder %s2282_s23, 3 }
  0x11   : > { %p2757_p4 = por %p2749_p1, %p52_p0  ;;  %p125_p5 = scmp.ne.s32.totalorder %s2628_s13, %s2624_s12 }
  0x12   : > { %p2763_p6 = por %p120_p3, %p119_p2  ;;  %p126_p7 = scmp.eq.s32.totalorder %s2283_s24, 3 }
  0x13   : > { %p2284_p8 = scmp.ge.s32.totalorder %s2664_s22, 1  ;;  %p133_p9 = scmp.lt.s32.totalorder %s2664_s22, 5 }
  0x14   : > { %s3933_s27 = scalar_select %p2763_p6, 1, 0 }
  0x15   : > { %p2769_p10 = por %p126_p7, %p125_p5  ;;  %p2773_p11 = pnand %p2284_p8, %p133_p9 }
  0x16   : > { %3934 = sst [smem:[#allocation13_spill]] %s3933_s27  ;;  %s2666_s6 = smov [#allocation5]  }
  0x17   : > { %s3935_s28 = scalar_select %p2769_p10, 1, 0 }
  0x18   : > { %s3938_s1 = sld [smem:[#allocation40_spill]]  ;;  %p2349_p12 = pneg %p2773_p11 }
  0x19   : > { %3936 = sst [smem:[#allocation14_spill]] %s3935_s28  ;;  %s146_s7 = sshll.u32 %s2666_s6, 4  ;;  %s147_s7 = int_to_ptr.vmem [resolvable:$true] %s146_s7 }
  0x1a   : > { %p2350_p13 = pnand %p2349_p12, %p2749_p1  ;;  %s2667_s8 = smov 1536  }
  0x1b   : > { %s2668_s9 = smov 96   ;;  %s29_s10 = sadd.s32 1, %s2656_s20 }
  0x1c   : > { %s32_s11 = sadd.s32 1, %s2660_s21  ;;  %p30_p0 = scmp.ge.s32.totalorder %s29_s10, 2 }
  0x1d   : > { %s39_s15 = sadd.s32 1, %s2644_s17  ;;  %p46_p2 = scmp.ne.s32.totalorder %s2644_s17, %s2640_s16 }
  0x1e   : > { %s144_s5 = sshll.u32 %s3938_s1, 4  ;;  %p47_p3 = scmp.eq.s32.totalorder %s2664_s22, 0  ;;  %s145_s5 = int_to_ptr.hbm [resolvable:$true] %s144_s5 }
  0x1f   : > { %2352 = dma.hbm_to_vmem [thread:$0]  (!%p2350_p13), %s145_s5, 24576, %s147_s7, [#allocation6], %s2667_s8, %s2667_s8, %s2668_s9  }
  0x20   : > { %s4092_s10 = smov (%p30_p0, %s29_s10), 0  ;;  %s4094_s11 = smov (!%p30_p0, %s32_s11), %s2660_s21 }
  0x21   : > { %3939 = sst [smem:[#allocation15_spill]] %s4092_s10  ;;  %p2793_p5 = por %p47_p3, %p46_p2 }
  0x22   : > { %s105_s24 = ssub.s32 %s2656_s20, %s4092_s10  ;;  %p34_p7 = scmp.ge.s32.totalorder %s4094_s11, 2 }
  0x23   : > { %s109_s30 = sadd.s32 1, %s2632_s14  ;;  %p2362_p8 = scmp.lt.s32.totalorder %s2664_s22, 4 }
  0x24   : > { %s163_s4 = sand.u32 1, %s2644_s17   ;;  %s4096_s11 = smov (%p34_p7, %s4094_s11), 0 }
  0x25   : > { %3941 = sst [smem:[#allocation16_spill]] %s4096_s11  ;;  %s2287_s5 = sshll.u32 %s163_s4, 8 }
  0x26   : > { %s36_s6 = ssub.s32 %s2660_s21, %s4096_s11  ;;  %s2338_s8 = sshll.u32 %s2660_s21, 8 }
  0x27   : > { %p37_p9 = scmp.eq.s32.totalorder %s36_s6, 0  ;;  %s106_s7 = sor.u32 %s105_s24, %s36_s6 }
  0x28   : > { %p107_p12 = scmp.eq.s32.totalorder %s106_s7, 0  ;;  %s172_s28 = scalar_lea.hbm %s3890_s0, %s2338_s8 }
  0x29   : > { %s2808_s9 = scalar_select %p37_p9, %s2644_s17, %s39_s15  }
  0x2a   : > { %s2811_s1 = scalar_select %p107_p12, %s2632_s14, %s109_s30  }
  0x2b   : > { %s167_s12 = scalar_lea.vmem [#allocation2], %s2287_s5  ;;  %s173_s3 = sshll.u32 %s172_s28, 4  ;;  %s174_s3 = int_to_ptr.hbm [resolvable:$true] %s173_s3 }
  0x2c   : > { %s175_s27 = sshll.u32 %s167_s12, 4  ;;  %p2354_p13 = pnand %p2362_p8, %p2793_p5  ;;  %s176_s27 = int_to_ptr.vmem [resolvable:$true] %s175_s27 }
  0x2d   : > { %s164_s11 = scalar_lea.sflag [#allocation3], %s163_s4  ;;  %s2669_s24 = smov 128  }
  0x2e   : > { %s2670_s6 = smov 8   ;;  %187 = sbr.rel (%p2773_p11) target bundleno = 708 (0x2c4), region = 32 }
  0x2f   : > { %2356 = dma.hbm_to_vmem [thread:$0]  (!%p2354_p13), %s174_s3, 4096, %s176_s27, %s164_s11, %s2669_s24, %s2669_s24, %s2670_s6  }
  0x33   : > { %s189_s15 = sand.u32 1, %s2640_s16  }
  0x34   : > { %s2291_s20 = sshll.u32 %s189_s15, 8  ;;  %s190_s10 = scalar_lea.sflag [#allocation3], %s189_s15 }
  0x35   : > { %s2823_s30 = scalar_lea.vmem [#allocation2], %s2291_s20 }
  0x36   : > { %2611 = dma.done.wait (%p2757_p4), %s190_s10, 4096  }
  0x37   : > { %2613 = vsyncadd (%p2757_p4), %s190_s10, 4294963200 }
  0x38   : > { %2615 = dma.done.wait (%p2749_p1), [#allocation6], 24576  }
  0x39   : > { %2617 = vsyncadd (%p2749_p1), [#allocation6], 4294942720  ;;  %v448_v0 = vld [vmem:[#allocation5 + $0x5a0] sm:$0xff]  ;;  %v449_v1 = vld [vmem:[#allocation5 + $0x5a8] sm:$0xff]  ;;  %s2834_s3 = sshll.u32 %s2648_s18, 3  ;;  %s2339_s11 = sshll.u32 %s2648_s18, 7 }
  0x3a   : > { %v450_v2 = vld [vmem:[#allocation5 + $0x5b0] sm:$0xff]  ;;  %460 = vmatpush.msra.mxu0 %v448_v0  ;;  %533 = vmatpush.msra.mxu1 %v449_v1  ;;  %v451_v3 = vld [vmem:[#allocation5 + $0x5b8] sm:$0xff]  ;;  %v436_v4 = vld [vmem:[#allocation5 + $0x540] sm:$0xff]  ;;  %s2296_s12 = sadd.s32 4294967295, %s2834_s3  ;;  %p249_p4 = scmp.gt.s32.totalorder %s2834_s3, 0 }
  0x3b   : > { %v437_v5 = vld [vmem:[#allocation5 + $0x548] sm:$0xff]  ;;  %606 = vmatpush.msra.mxu2 %v450_v2  ;;  %679 = vmatpush.msra.mxu3 %v451_v3  ;;  %v438_v6 = vld [vmem:[#allocation5 + $0x550] sm:$0xff]  ;;  %v439_v7 = vld [vmem:[#allocation5 + $0x558] sm:$0xff]  ;;  %p2839_p1 = scmp.gt.s32.totalorder %s2296_s12, 0  ;;  %s2875_s23 = scalar_lea.vmem %s2823_s30, %s2339_s11 [#allocation2] }
  0x3c   : > { %v424_v8 = vld [vmem:[#allocation5 + $0x4e0] sm:$0xff]  ;;  %461 = vmatpush.msra.mxu0 %v436_v4  ;;  %534 = vmatpush.msra.mxu1 %v437_v5  ;;  %v425_v9 = vld [vmem:[#allocation5 + $0x4e8] sm:$0xff]  ;;  %v426_v10 = vld [vmem:[#allocation5 + $0x4f0] sm:$0xff]  ;;  %s2852_s26 = scalar_select %p249_p4, 1, 0 }
  0x3d   : > { %v427_v11 = vld [vmem:[#allocation5 + $0x4f8] sm:$0xff]  ;;  %607 = vmatpush.msra.mxu2 %v438_v6  ;;  %680 = vmatpush.msra.mxu3 %v439_v7  ;;  %v412_v12 = vld [vmem:[#allocation5 + $0x480] sm:$0xff]  ;;  %v413_v13 = vld [vmem:[#allocation5 + $0x488] sm:$0xff]  ;;  %s4098_s12 = smov (!%p2839_p1, %s2296_s12), 0  ;;  %s255_s4 = sadd.s32 8, %s2834_s3 }
  0x3e   : > { %462 = vmatpush.msra.mxu0 %v424_v8  ;;  %535 = vmatpush.msra.mxu1 %v425_v9  ;;  %v414_v14 = vld [vmem:[#allocation5 + $0x490] sm:$0xff]  ;;  %v415_v15 = vld [vmem:[#allocation5 + $0x498] sm:$0xff]  ;;  %v400_v16 = vld [vmem:[#allocation5 + $0x420] sm:$0xff]  ;;  %s2297_s27 = sshll.u32 %s4098_s12, 4  ;;  %s251_s28 = scvt.s32.f32 %s2852_s26 }
  0x3f   : > { %608 = vmatpush.msra.mxu2 %v426_v10  ;;  %681 = vmatpush.msra.mxu3 %v427_v11  ;;  %v401_v17 = vld [vmem:[#allocation5 + $0x428] sm:$0xff]  ;;  %v402_v18 = vld [vmem:[#allocation5 + $0x430] sm:$0xff]  ;;  %v403_v19 = vld [vmem:[#allocation5 + $0x438] sm:$0xff]  ;;  %s2857_s29 = scalar_lea.vmem %s2823_s30, %s2297_s27 [#allocation2]  ;;  %p256_p11 = scmp.lt.s32.totalorder %s255_s4, 15 }
  0x40   : > { %463 = vmatpush.msra.mxu0 %v412_v12  ;;  %536 = vmatpush.msra.mxu1 %v413_v13  ;;  %v388_v20 = vld [vmem:[#allocation5 + $0x3c0] sm:$0xff]  ;;  %v389_v21 = vld [vmem:[#allocation5 + $0x3c8] sm:$0xff]  ;;  %v390_v22 = vld [vmem:[#allocation5 + $0x3d0] sm:$0xff]  ;;  %v252_v59 = vstv %s251_s28  ;;  %p262_p0 = scmp.lt.s32.totalorder %s255_s4, 16  ;;  %s219_s20 = sand.u32 1, %s2628_s13  }
  0x41   : > { %609 = vmatpush.msra.mxu2 %v414_v14  ;;  %682 = vmatpush.msra.mxu3 %v415_v15  ;;  %v391_v23 = vld [vmem:[#allocation5 + $0x3d8] sm:$0xff]  ;;  %v376_v24 = vld [vmem:[#allocation5 + $0x360] sm:$0xff]  ;;  %v377_v25 = vld [vmem:[#allocation5 + $0x368] sm:$0xff]  ;;  %s4100_s4 = smov (!%p256_p11, %s255_s4), 15  ;;  %s2293_s10 = sshll.u32 %s219_s20, 9 }
  0x42   : > { %464 = vmatpush.msra.mxu0 %v400_v16  ;;  %537 = vmatpush.msra.mxu1 %v401_v17  ;;  %v378_v26 = vld [vmem:[#allocation5 + $0x370] sm:$0xff]  ;;  %v379_v27 = vld [vmem:[#allocation5 + $0x378] sm:$0xff]  ;;  %v364_v28 = vld [vmem:[#allocation5 + $0x300] sm:$0xff]  ;;  %s263_s5 = scalar_select %p262_p0, 1, 0 }
  0x43   : > { %610 = vmatpush.msra.mxu2 %v402_v18  ;;  %683 = vmatpush.msra.mxu3 %v403_v19  ;;  %v365_v29 = vld [vmem:[#allocation5 + $0x308] sm:$0xff]  ;;  %v366_v30 = vld [vmem:[#allocation5 + $0x310] sm:$0xff]  ;;  %v367_v31 = vld [vmem:[#allocation5 + $0x318] sm:$0xff]  ;;  %s2298_s7 = sshll.u32 %s4100_s4, 4  ;;  %s2340_s25 = sshll.u32 %s2648_s18, 6 }
  0x44   : > { %465 = vmatpush.msra.mxu0 %v388_v20  ;;  %538 = vmatpush.msra.mxu1 %v389_v21  ;;  %v352_v32 = vld [vmem:[#allocation5 + $0x2a0] sm:$0xff]  ;;  %v353_v33 = vld [vmem:[#allocation5 + $0x2a8] sm:$0xff]  ;;  %v354_v34 = vld [vmem:[#allocation5 + $0x2b0] sm:$0xff]  ;;  %s264_s8 = scvt.s32.f32 %s263_s5  ;;  %s259_s24 = scalar_lea.vmem %s2823_s30, %s2298_s7 [#allocation2] }
  0x45   : > { %611 = vmatpush.msra.mxu2 %v390_v22  ;;  %684 = vmatpush.msra.mxu3 %v391_v23  ;;  %v355_v35 = vld [vmem:[#allocation5 + $0x2b8] sm:$0xff]  ;;  %v340_v36 = vld [vmem:[#allocation5 + $0x240] sm:$0xff]  ;;  %v341_v37 = vld [vmem:[#allocation5 + $0x248] sm:$0xff]  ;;  %s3285_s30 = scalar_lea.vmem [#allocation7], %s2293_s10  ;;  %s2334_s26 = sshll.u32 %s2652_s19, 7 }
  0x46   : > { %466 = vmatpush.msra.mxu0 %v376_v24  ;;  %539 = vmatpush.msra.mxu1 %v377_v25  ;;  %v342_v38 = vld [vmem:[#allocation5 + $0x250] sm:$0xff]  ;;  %v343_v39 = vld [vmem:[#allocation5 + $0x258] sm:$0xff]  ;;  %v328_v40 = vld [vmem:[#allocation5 + $0x1e0] sm:$0xff]  ;;  %s2173_s27 = sadd.s32 %s2340_s25, %s2334_s26  ;;  %s2161_s7 = scalar_lea.sflag [#allocation4], %s219_s20 }
  0x47   : > { %612 = vmatpush.msra.mxu2 %v378_v26  ;;  %685 = vmatpush.msra.mxu3 %v379_v27  ;;  %v329_v41 = vld [vmem:[#allocation5 + $0x1e8] sm:$0xff]  ;;  %v330_v42 = vld [vmem:[#allocation5 + $0x1f0] sm:$0xff]  ;;  %v331_v43 = vld [vmem:[#allocation5 + $0x1f8] sm:$0xff]  ;;  %s2335_s18 = sshll.u32 %s2173_s27, 3 }
  0x48   : > { %467 = vmatpush.msra.mxu0 %v364_v28  ;;  %540 = vmatpush.msra.mxu1 %v365_v29  ;;  %v316_v44 = vld [vmem:[#allocation5 + $0x180] sm:$0xff]  ;;  %v317_v45 = vld [vmem:[#allocation5 + $0x188] sm:$0xff]  ;;  %v318_v46 = vld [vmem:[#allocation5 + $0x190] sm:$0xff] }
  0x49   : > { %613 = vmatpush.msra.mxu2 %v366_v30  ;;  %686 = vmatpush.msra.mxu3 %v367_v31  ;;  %v319_v47 = vld [vmem:[#allocation5 + $0x198] sm:$0xff]  ;;  %v304_v48 = vld [vmem:[#allocation5 + $0x120] sm:$0xff]  ;;  %v305_v49 = vld [vmem:[#allocation5 + $0x128] sm:$0xff] }
  0x4a   : > { %468 = vmatpush.msra.mxu0 %v352_v32  ;;  %541 = vmatpush.msra.mxu1 %v353_v33  ;;  %v306_v50 = vld [vmem:[#allocation5 + $0x130] sm:$0xff]  ;;  %v307_v51 = vld [vmem:[#allocation5 + $0x138] sm:$0xff]  ;;  %v292_v52 = vld [vmem:[#allocation5 + $0xc0] sm:$0xff] }
  0x4b   : > { %614 = vmatpush.msra.mxu2 %v354_v34  ;;  %687 = vmatpush.msra.mxu3 %v355_v35  ;;  %v293_v53 = vld [vmem:[#allocation5 + $0xc8] sm:$0xff]  ;;  %v294_v54 = vld [vmem:[#allocation5 + $0xd0] sm:$0xff]  ;;  %v295_v55 = vld [vmem:[#allocation5 + $0xd8] sm:$0xff] }
  0x4c   : > { %469 = vmatpush.msra.mxu0 %v340_v36  ;;  %542 = vmatpush.msra.mxu1 %v341_v37  ;;  %v280_v56 = vld [vmem:[#allocation5 + $0x60] sm:$0xff]  ;;  %v281_v57 = vld [vmem:[#allocation5 + $0x68] sm:$0xff]  ;;  %v282_v60 = vld [vmem:[#allocation5 + $0x70] sm:$0xff] }
  0x4d   : > { %615 = vmatpush.msra.mxu2 %v342_v38  ;;  %688 = vmatpush.msra.mxu3 %v343_v39  ;;  %v247_v58 = vld [vmem:[%s2857_s29] sm:$0xff]  ;;  %v283_v61 = vld [vmem:[#allocation5 + $0x78] sm:$0xff]  ;;  %v269_v63 = vld [vmem:[#allocation5 + $0x8] sm:$0xff] }
  0x4e   : > { %470 = vmatpush.msra.mxu0 %v328_v40  ;;  %543 = vmatpush.msra.mxu1 %v329_v41  ;;  %v268_v62 = vld [vmem:[#allocation5] sm:$0xff]  ;;  %v270_v0 = vld [vmem:[#allocation5 + $0x10] sm:$0xff]  ;;  %v271_v1 = vld [vmem:[#allocation5 + $0x18] sm:$0xff]  ;;  %v2860_v2 = vmul.f32 %v252_v59, %v247_v58 }
  0x4f   : > { %616 = vmatpush.msra.mxu2 %v330_v42  ;;  %689 = vmatpush.msra.mxu3 %v331_v43  ;;  %v454_v3 = vld [vmem:[#allocation5 + $0x5d0] sm:$0xff]  ;;  %v455_v4 = vld [vmem:[#allocation5 + $0x5d8] sm:$0xff]  ;;  %v453_v5 = vld [vmem:[#allocation5 + $0x5c8] sm:$0xff] }
  0x50   : > { %471 = vmatpush.msra.mxu0 %v316_v44  ;;  %544 = vmatpush.msra.mxu1 %v317_v45  ;;  %v452_v6 = vld [vmem:[#allocation5 + $0x5c0] sm:$0xff]  ;;  %v248_v7 = vld [vmem:[%s2857_s29 + $0x8] sm:$0xff]  ;;  %v442_v8 = vld [vmem:[#allocation5 + $0x570] sm:$0xff]  ;;  %s4069_s29 = sld [smem:[#allocation41_spill]] }
  0x51   : > { %617 = vmatpush.msra.mxu2 %v318_v46  ;;  %690 = vmatpush.msra.mxu3 %v319_v47  ;;  %v443_v9 = vld [vmem:[#allocation5 + $0x578] sm:$0xff]  ;;  %v441_v10 = vld [vmem:[#allocation5 + $0x568] sm:$0xff]  ;;  %v440_v11 = vld [vmem:[#allocation5 + $0x560] sm:$0xff]  ;;  %v2867_v14 = vmul.f32 %v252_v59, %v248_v7 }
  0x52   : > { %472 = vmatpush.msra.mxu0 %v304_v48  ;;  %545 = vmatpush.msra.mxu1 %v305_v49  ;;  %v430_v12 = vld [vmem:[#allocation5 + $0x510] sm:$0xff]  ;;  %v431_v13 = vld [vmem:[#allocation5 + $0x518] sm:$0xff]  ;;  %v429_v15 = vld [vmem:[#allocation5 + $0x508] sm:$0xff] }
  0x53   : > { %618 = vmatpush.msra.mxu2 %v306_v50  ;;  %691 = vmatpush.msra.mxu3 %v307_v51  ;;  %v428_v16 = vld [vmem:[#allocation5 + $0x500] sm:$0xff]  ;;  %v418_v17 = vld [vmem:[#allocation5 + $0x4b0] sm:$0xff]  ;;  %v419_v18 = vld [vmem:[#allocation5 + $0x4b8] sm:$0xff] }
  0x54   : > { %473 = vmatpush.msra.mxu0 %v292_v52  ;;  %546 = vmatpush.msra.mxu1 %v293_v53  ;;  %v417_v19 = vld [vmem:[#allocation5 + $0x4a8] sm:$0xff]  ;;  %v406_v20 = vld [vmem:[#allocation5 + $0x450] sm:$0xff]  ;;  %v407_v21 = vld [vmem:[#allocation5 + $0x458] sm:$0xff] }
  0x55   : > { %619 = vmatpush.msra.mxu2 %v294_v54  ;;  %692 = vmatpush.msra.mxu3 %v295_v55  ;;  %v405_v22 = vld [vmem:[#allocation5 + $0x448] sm:$0xff]  ;;  %v416_v23 = vld [vmem:[#allocation5 + $0x4a0] sm:$0xff]  ;;  %v394_v25 = vld [vmem:[#allocation5 + $0x3f0] sm:$0xff] }
  0x56   : > { %474 = vmatpush.msra.mxu0 %v280_v56  ;;  %547 = vmatpush.msra.mxu1 %v281_v57  ;;  %v2878_v24 = vld [vmem:[%s2875_s23] sm:$0xff]  ;;  %v395_v26 = vld [vmem:[#allocation5 + $0x3f8] sm:$0xff]  ;;  %v393_v27 = vld [vmem:[#allocation5 + $0x3e8] sm:$0xff]  ;;  %s2175_s11 = scalar_lea.hbm %s4069_s29, %s2335_s18  ;;  %s2558_s10 = scalar_lea.hbm %s4069_s29, 2048 }
  0x57   : > { %620 = vmatpush.msra.mxu2 %v282_v60  ;;  %693 = vmatpush.msra.mxu3 %v283_v61  ;;  %v2885_v28 = vld [vmem:[%s2875_s23 + $0x8] sm:$0xff]  ;;  %v404_v29 = vld [vmem:[#allocation5 + $0x440] sm:$0xff]  ;;  %v382_v30 = vld [vmem:[#allocation5 + $0x390] sm:$0xff]  ;;  %s2178_s4 = sshll.u32 %s2175_s11, 4  ;;  %s2179_s4 = int_to_ptr.hbm [resolvable:$true] %s2178_s4 }
  0x58   : > { %475 = vmatpush.msra.mxu0 %v268_v62  ;;  %548 = vmatpush.msra.mxu1 %v269_v63  ;;  %v383_v31 = vld [vmem:[#allocation5 + $0x398] sm:$0xff]  ;;  %v2892_v32 = vld [vmem:[%s2875_s23 + $0x10] sm:$0xff]  ;;  %v381_v33 = vld [vmem:[#allocation5 + $0x388] sm:$0xff] }
  0x59   : > { %621 = vmatpush.msra.mxu2 %v270_v0  ;;  %694 = vmatpush.msra.mxu3 %v271_v1  ;;  %v392_v34 = vld [vmem:[#allocation5 + $0x3e0] sm:$0xff]  ;;  %v370_v35 = vld [vmem:[#allocation5 + $0x330] sm:$0xff]  ;;  %v371_v36 = vld [vmem:[#allocation5 + $0x338] sm:$0xff] }
  0x5a   : > { %476 = vmatmul.f32.vlgmr.msra.gmra.mxu0 %v2860_v2  ;;  %549 = vmatmul.f32.vlgmr.msra.gmra.mxu1 %v2860_v2  ;;  %v2899_v37 = vld [vmem:[%s2875_s23 + $0x18] sm:$0xff]  ;;  %v369_v38 = vld [vmem:[#allocation5 + $0x328] sm:$0xff]  ;;  %v380_v39 = vld [vmem:[#allocation5 + $0x380] sm:$0xff] }
  0x5b   : > { %622 = vmatmul.f32.vlgmr.msra.gmra.mxu2 %v2860_v2  ;;  %695 = vmatmul.f32.vlgmr.msra.gmra.mxu3 %v2860_v2  ;;  %v2906_v40 = vld [vmem:[%s2875_s23 + $0x20] sm:$0xff]  ;;  %v358_v41 = vld [vmem:[#allocation5 + $0x2d0] sm:$0xff]  ;;  %v359_v42 = vld [vmem:[#allocation5 + $0x2d8] sm:$0xff] }
  0x5c   : > { %898 = vmatpush.msrb.mxu2 %v454_v3  ;;  %971 = vmatpush.msrb.mxu3 %v455_v4  ;;  %v357_v43 = vld [vmem:[#allocation5 + $0x2c8] sm:$0xff]  ;;  %v368_v44 = vld [vmem:[#allocation5 + $0x320] sm:$0xff]  ;;  %v346_v46 = vld [vmem:[#allocation5 + $0x270] sm:$0xff] }
  0x5d   : > { %825 = vmatpush.msrb.mxu1 %v453_v5  ;;  %752 = vmatpush.msrb.mxu0 %v452_v6  ;;  %v2913_v45 = vld [vmem:[%s2875_s23 + $0x28] sm:$0xff]  ;;  %v347_v47 = vld [vmem:[#allocation5 + $0x278] sm:$0xff]  ;;  %v2920_v49 = vld [vmem:[%s2875_s23 + $0x30] sm:$0xff] }
  0x5e   : > { %899 = vmatpush.msrb.mxu2 %v442_v8  ;;  %972 = vmatpush.msrb.mxu3 %v443_v9  ;;  %v345_v48 = vld [vmem:[#allocation5 + $0x268] sm:$0xff]  ;;  %v356_v50 = vld [vmem:[#allocation5 + $0x2c0] sm:$0xff]  ;;  %v334_v51 = vld [vmem:[#allocation5 + $0x210] sm:$0xff] }
  0x5f   : > { %826 = vmatpush.msrb.mxu1 %v441_v10  ;;  %753 = vmatpush.msrb.mxu0 %v440_v11  ;;  %v335_v52 = vld [vmem:[#allocation5 + $0x218] sm:$0xff]  ;;  %v333_v54 = vld [vmem:[#allocation5 + $0x208] sm:$0xff]  ;;  %v344_v55 = vld [vmem:[#allocation5 + $0x260] sm:$0xff] }
  0x60   : > { %900 = vmatpush.msrb.mxu2 %v430_v12  ;;  %973 = vmatpush.msrb.mxu3 %v431_v13  ;;  %v2927_v53 = vld [vmem:[%s2875_s23 + $0x38] sm:$0xff]  ;;  %v322_v56 = vld [vmem:[#allocation5 + $0x1b0] sm:$0xff]  ;;  %v2934_v58 = vld [vmem:[%s2875_s23 + $0x40] sm:$0xff] }
  0x61   : > { %827 = vmatpush.msrb.mxu1 %v429_v15  ;;  %754 = vmatpush.msrb.mxu0 %v428_v16  ;;  %v323_v57 = vld [vmem:[#allocation5 + $0x1b8] sm:$0xff]  ;;  %v321_v59 = vld [vmem:[#allocation5 + $0x1a8] sm:$0xff]  ;;  %v332_v60 = vld [vmem:[#allocation5 + $0x200] sm:$0xff] }
  0x62   : > { %479 = vmatmul.f32.gmra.mxu0 %v2867_v14  ;;  %552 = vmatmul.f32.gmra.mxu1 %v2867_v14  ;;  %v2941_v61 = vld [vmem:[%s2875_s23 + $0x48] sm:$0xff]  ;;  %v310_v62 = vld [vmem:[#allocation5 + $0x150] sm:$0xff]  ;;  %v311_v63 = vld [vmem:[#allocation5 + $0x158] sm:$0xff] }
  0x63   : > { %625 = vmatmul.f32.gmra.mxu2 %v2867_v14  ;;  %697 = vmatmul.f32.gmra.mxu3 %v2867_v14  ;;  %v309_v0 = vld [vmem:[#allocation5 + $0x148] sm:$0xff]  ;;  %v2948_v1 = vld [vmem:[%s2875_s23 + $0x50] sm:$0xff]  ;;  %v320_v3 = vld [vmem:[#allocation5 + $0x1a0] sm:$0xff] }
  0x64   : > { %901 = vmatpush.msrb.mxu2 %v418_v17  ;;  %974 = vmatpush.msrb.mxu3 %v419_v18  ;;  %v298_v4 = vld [vmem:[#allocation5 + $0xf0] sm:$0xff]  ;;  %v299_v5 = vld [vmem:[#allocation5 + $0xf8] sm:$0xff]  ;;  %v297_v7 = vld [vmem:[#allocation5 + $0xe8] sm:$0xff] }
  0x65   : > { %828 = vmatpush.msrb.mxu1 %v417_v19  ;;  %755 = vmatpush.msrb.mxu0 %v416_v23  ;;  %v2955_v6 = vld [vmem:[%s2875_s23 + $0x58] sm:$0xff]  ;;  %v308_v8 = vld [vmem:[#allocation5 + $0x140] sm:$0xff]  ;;  %v286_v9 = vld [vmem:[#allocation5 + $0x90] sm:$0xff] }
  0x66   : > { %902 = vmatpush.msrb.mxu2 %v406_v20  ;;  %975 = vmatpush.msrb.mxu3 %v407_v21  ;;  %v287_v10 = vld [vmem:[#allocation5 + $0x98] sm:$0xff]  ;;  %v2962_v11 = vld [vmem:[%s2875_s23 + $0x60] sm:$0xff]  ;;  %v285_v12 = vld [vmem:[#allocation5 + $0x88] sm:$0xff] }
  0x67   : > { %829 = vmatpush.msrb.mxu1 %v405_v22  ;;  %756 = vmatpush.msrb.mxu0 %v404_v29  ;;  %v296_v13 = vld [vmem:[#allocation5 + $0xe0] sm:$0xff]  ;;  %v2969_v15 = vld [vmem:[%s2875_s23 + $0x68] sm:$0xff]  ;;  %v274_v16 = vld [vmem:[#allocation5 + $0x30] sm:$0xff] }
  0x68   : > { %903 = vmatpush.msrb.mxu2 %v394_v25  ;;  %976 = vmatpush.msrb.mxu3 %v395_v26  ;;  %v275_v17 = vld [vmem:[#allocation5 + $0x38] sm:$0xff]  ;;  %v273_v18 = vld [vmem:[#allocation5 + $0x28] sm:$0xff]  ;;  %v2979_v21 = vld [vmem:[%s2875_s23 + $0x70] sm:$0xff] }
  0x69   : > { %830 = vmatpush.msrb.mxu1 %v393_v27  ;;  %757 = vmatpush.msrb.mxu0 %v392_v34  ;;  %v284_v22 = vld [vmem:[#allocation5 + $0x80] sm:$0xff]  ;;  %v458_v25 = vld [vmem:[#allocation5 + $0x5f0] sm:$0xff]  ;;  %v459_v26 = vld [vmem:[#allocation5 + $0x5f8] sm:$0xff] }
  0x6a   : > { %482 = vmatmul.f32.gmra.mxu0 %v2878_v24  ;;  %555 = vmatmul.f32.gmra.mxu1 %v2878_v24  ;;  %v272_v23 = vld [vmem:[#allocation5 + $0x20] sm:$0xff]  ;;  %v457_v34 = vld [vmem:[#allocation5 + $0x5e8] sm:$0xff] }
  0x6b   : > { %628 = vmatmul.f32.gmra.mxu2 %v2878_v24  ;;  %699 = vmatmul.f32.gmra.mxu3 %v2878_v24 }
  0x6c   : > { %904 = vmatpush.msrb.mxu2 %v382_v30  ;;  %977 = vmatpush.msrb.mxu3 %v383_v31 }
  0x6d   : > { %831 = vmatpush.msrb.mxu1 %v381_v33  ;;  %758 = vmatpush.msrb.mxu0 %v380_v39  ;;  %v2990_v33 = vld [vmem:[%s2875_s23 + $0x78] sm:$0xff] }
  0x6e   : > { %905 = vmatpush.msrb.mxu2 %v370_v35  ;;  %978 = vmatpush.msrb.mxu3 %v371_v36  ;;  %v260_v35 = vld [vmem:[%s259_s24] sm:$0xff]  ;;  %v265_v36 = vstv %s264_s8  ;;  %v447_v39 = vld [vmem:[#allocation5 + $0x598] sm:$0xff]  ;;  %s2552_s8 = sshra.s32 %s2179_s4, 4  ;;  %s2553_s8 = int_to_ptr.hbm [resolvable:$true] %s2552_s8 }
  0x6f   : > { %832 = vmatpush.msrb.mxu1 %v369_v38  ;;  %759 = vmatpush.msrb.mxu0 %v368_v44  ;;  %v446_v38 = vld [vmem:[#allocation5 + $0x590] sm:$0xff]  ;;  %p2559_p7 = scmp.lt.s32.totalorder %s2553_s8, %s4069_s29 }
  0x70   : > { %906 = vmatpush.msrb.mxu2 %v358_v41  ;;  %979 = vmatpush.msrb.mxu3 %v359_v42 }
  0x71   : > { %833 = vmatpush.msrb.mxu1 %v357_v43  ;;  %760 = vmatpush.msrb.mxu0 %v356_v50  ;;  %v2999_v43 = vmul.f32 %v265_v36, %v260_v35  ;;  %v456_v50 = vld [vmem:[#allocation5 + $0x5e0] sm:$0xff]  ;;  %v411_v35 = vld [vmem:[#allocation5 + $0x478] sm:$0xff] }
  0x72   : > { %485 = vmatmul.f32.gmra.mxu0 %v2885_v28  ;;  %558 = vmatmul.f32.gmra.mxu1 %v2885_v28 }
  0x73   : > { %631 = vmatmul.f32.gmra.mxu2 %v2885_v28  ;;  %702 = vmatmul.f32.gmra.mxu3 %v2885_v28 }
  0x74   : > { %907 = vmatpush.msrb.mxu2 %v346_v46  ;;  %980 = vmatpush.msrb.mxu3 %v347_v47  ;;  %v445_v47 = vld [vmem:[#allocation5 + $0x588] sm:$0xff] }
  0x75   : > { %834 = vmatpush.msrb.mxu1 %v345_v48  ;;  %761 = vmatpush.msrb.mxu0 %v344_v55  ;;  %v261_v48 = vld [vmem:[%s259_s24 + $0x8] sm:$0xff]  ;;  %s2554_s24 = scalar_lea.hbm %s2553_s8, 512 }
  0x76   : > { %908 = vmatpush.msrb.mxu2 %v334_v51  ;;  %981 = vmatpush.msrb.mxu3 %v335_v52  ;;  %p2555_p2 = scmp.ne.s32.totalorder %s2553_s8, %s2554_s24  ;;  %p2560_p8 = scmp.lt.s32.totalorder %s2558_s10, %s2554_s24 }
  0x77   : > { %835 = vmatpush.msrb.mxu1 %v333_v54  ;;  %762 = vmatpush.msrb.mxu0 %v332_v60  ;;  %v3009_v54 = vmul.f32 %v265_v36, %v261_v48  ;;  %v434_v60 = vld [vmem:[#allocation5 + $0x530] sm:$0xff] }
  0x78   : > { %909 = vmatpush.msrb.mxu2 %v322_v56  ;;  %982 = vmatpush.msrb.mxu3 %v323_v57  ;;  %p2556_p3 = pnand %p2555_p2, %p2763_p6  ;;  %p2561_p9 = por %p2560_p8, %p2559_p7 }
  0x79   : > { %836 = vmatpush.msrb.mxu1 %v321_v59  ;;  %763 = vmatpush.msrb.mxu0 %v320_v3  ;;  %3943 = vst [vmem:[#allocation17_spill] sm:$0xff] %v3009_v54  ;;  %v1433_v59 = vlaneseq }
  0x7a   : > { %488 = vmatmul.f32.gmra.mxu0 %v2892_v32  ;;  %561 = vmatmul.f32.gmra.mxu1 %v2892_v32  ;;  %p2557_p5 = pneg %p2556_p3 }
  0x7b   : > { %634 = vmatmul.f32.gmra.mxu2 %v2892_v32  ;;  %705 = vmatmul.f32.gmra.mxu3 %v2892_v32  ;;  %v3019_v3 = vshrl.u32 %v1433_v59, 7  ;;  %v398_v59 = vld [vmem:[#allocation5 + $0x410] sm:$0xff] }
  0x7c   : > { %910 = vmatpush.msrb.mxu2 %v310_v62  ;;  %983 = vmatpush.msrb.mxu3 %v311_v63  ;;  %v435_v62 = vld [vmem:[#allocation5 + $0x538] sm:$0xff]  ;;  %v433_v63 = vld [vmem:[#allocation5 + $0x528] sm:$0xff]  ;;  %p2562_p12 = pnand %p2561_p9, %p2557_p5 }
  0x7d   : > { %837 = vmatpush.msrb.mxu1 %v309_v0  ;;  %764 = vmatpush.msrb.mxu0 %v308_v8  ;;  %v444_v0 = vld [vmem:[#allocation5 + $0x580] sm:$0xff]  ;;  %vm3915_vm0 = vcmp.lt.s32.totalorder %v3019_v3, 1  ;;  %vm3917_vm2 = vcmp.lt.s32.totalorder %v3019_v3, 7 }
  0x7e   : > { %911 = vmatpush.msrb.mxu2 %v298_v4  ;;  %984 = vmatpush.msrb.mxu3 %v299_v5 }
  0x7f   : > { %838 = vmatpush.msrb.mxu1 %v297_v7  ;;  %765 = vmatpush.msrb.mxu0 %v296_v13  ;;  %v422_v13 = vld [vmem:[#allocation5 + $0x4d0] sm:$0xff] }
  0x80   : > { %912 = vmatpush.msrb.mxu2 %v286_v9  ;;  %985 = vmatpush.msrb.mxu3 %v287_v10 }
  0x81   : > { %839 = vmatpush.msrb.mxu1 %v285_v12  ;;  %766 = vmatpush.msrb.mxu0 %v284_v22 }
  0x82   : > { %491 = vmatmul.f32.gmra.mxu0 %v2899_v37  ;;  %564 = vmatmul.f32.gmra.mxu1 %v2899_v37 }
  0x83   : > { %637 = vmatmul.f32.gmra.mxu2 %v2899_v37  ;;  %708 = vmatmul.f32.gmra.mxu3 %v2899_v37 }
  0x84   : > { %913 = vmatpush.msrb.mxu2 %v274_v16  ;;  %986 = vmatpush.msrb.mxu3 %v275_v17  ;;  %v423_v16 = vld [vmem:[#allocation5 + $0x4d8] sm:$0xff]  ;;  %v421_v17 = vld [vmem:[#allocation5 + $0x4c8] sm:$0xff] }
  0x85   : > { %840 = vmatpush.msrb.mxu1 %v273_v18  ;;  %767 = vmatpush.msrb.mxu0 %v272_v23 }
  0x86   : > { %1190 = vmatpush.msra.mxu2 %v458_v25  ;;  %1263 = vmatpush.msra.mxu3 %v459_v26 }
  0x87   : > { %1117 = vmatpush.msra.mxu1 %v457_v34  ;;  %1044 = vmatpush.msra.mxu0 %v456_v50  ;;  %v410_v34 = vld [vmem:[#allocation5 + $0x470] sm:$0xff]  ;;  %v409_v50 = vld [vmem:[#allocation5 + $0x468] sm:$0xff] }
  0x88   : > { %1191 = vmatpush.msra.mxu2 %v446_v38  ;;  %1264 = vmatpush.msra.mxu3 %v447_v39 }
  0x89   : > { %1118 = vmatpush.msra.mxu1 %v445_v47  ;;  %1045 = vmatpush.msra.mxu0 %v444_v0 }
  0x8a   : > { %494 = vmatmul.f32.gmra.mxu0 %v2906_v40  ;;  %567 = vmatmul.f32.gmra.mxu1 %v2906_v40 }
  0x8b   : > { %640 = vmatmul.f32.gmra.mxu2 %v2906_v40  ;;  %711 = vmatmul.f32.gmra.mxu3 %v2906_v40 }
  0x8c   : > { %1192 = vmatpush.msra.mxu2 %v434_v60  ;;  %1265 = vmatpush.msra.mxu3 %v435_v62  ;;  %v399_v60 = vld [vmem:[#allocation5 + $0x418] sm:$0xff] }
  0x8d   : > { %1119 = vmatpush.msra.mxu1 %v433_v63 }
  0x8e   : > { %1193 = vmatpush.msra.mxu2 %v422_v13  ;;  %1266 = vmatpush.msra.mxu3 %v423_v16  ;;  %v397_v13 = vld [vmem:[#allocation5 + $0x408] sm:$0xff]  ;;  %v408_v16 = vld [vmem:[#allocation5 + $0x460] sm:$0xff] }
  0x8f   : > { %1120 = vmatpush.msra.mxu1 %v421_v17 }
  0x90   : > { %1194 = vmatpush.msra.mxu2 %v410_v34  ;;  %1267 = vmatpush.msra.mxu3 %v411_v35 }
  0x91   : > { %1121 = vmatpush.msra.mxu1 %v409_v50  ;;  %v387_v50 = vld [vmem:[#allocation5 + $0x3b8] sm:$0xff] }
  0x92   : > { %497 = vmatmul.f32.gmra.mxu0 %v2913_v45  ;;  %570 = vmatmul.f32.gmra.mxu1 %v2913_v45 }
  0x93   : > { %643 = vmatmul.f32.gmra.mxu2 %v2913_v45  ;;  %714 = vmatmul.f32.gmra.mxu3 %v2913_v45 }
  0x94   : > { %1195 = vmatpush.msra.mxu2 %v398_v59  ;;  %1268 = vmatpush.msra.mxu3 %v399_v60 }
  0x95   : > { %1122 = vmatpush.msra.mxu1 %v397_v13 }
  0x96   : > { %1269 = vmatpush.msra.mxu3 %v387_v50 }
  0x9a   : > { %500 = vmatmul.f32.gmra.mxu0 %v2920_v49  ;;  %573 = vmatmul.f32.gmra.mxu1 %v2920_v49 }
  0x9b   : > { %646 = vmatmul.f32.gmra.mxu2 %v2920_v49  ;;  %717 = vmatmul.f32.gmra.mxu3 %v2920_v49 }
  0xa2   : > { %503 = vmatmul.f32.gmra.mxu0 %v2927_v53  ;;  %576 = vmatmul.f32.gmra.mxu1 %v2927_v53 }
  0xa3   : > { %649 = vmatmul.f32.gmra.mxu2 %v2927_v53  ;;  %720 = vmatmul.f32.gmra.mxu3 %v2927_v53 }
  0xaa   : > { %506 = vmatmul.f32.gmra.mxu0 %v2934_v58  ;;  %579 = vmatmul.f32.gmra.mxu1 %v2934_v58 }
  0xab   : > { %652 = vmatmul.f32.gmra.mxu2 %v2934_v58  ;;  %723 = vmatmul.f32.gmra.mxu3 %v2934_v58 }
  0xb2   : > { %509 = vmatmul.f32.gmra.mxu0 %v2941_v61  ;;  %582 = vmatmul.f32.gmra.mxu1 %v2941_v61 }
  0xb3   : > { %655 = vmatmul.f32.gmra.mxu2 %v2941_v61  ;;  %726 = vmatmul.f32.gmra.mxu3 %v2941_v61 }
  0xba   : > { %512 = vmatmul.f32.gmra.mxu0 %v2948_v1  ;;  %585 = vmatmul.f32.gmra.mxu1 %v2948_v1 }
  0xbb   : > { %658 = vmatmul.f32.gmra.mxu2 %v2948_v1  ;;  %729 = vmatmul.f32.gmra.mxu3 %v2948_v1 }
  0xc2   : > { %515 = vmatmul.f32.gmra.mxu0 %v2955_v6  ;;  %588 = vmatmul.f32.gmra.mxu1 %v2955_v6 }
  0xc3   : > { %661 = vmatmul.f32.gmra.mxu2 %v2955_v6  ;;  %732 = vmatmul.f32.gmra.mxu3 %v2955_v6 }
  0xca   : > { %518 = vmatmul.f32.gmra.mxu0 %v2962_v11  ;;  %591 = vmatmul.f32.gmra.mxu1 %v2962_v11 }
  0xcb   : > { %664 = vmatmul.f32.gmra.mxu2 %v2962_v11  ;;  %735 = vmatmul.f32.gmra.mxu3 %v2962_v11 }
  0xd2   : > { %521 = vmatmul.f32.gmra.mxu0 %v2969_v15  ;;  %594 = vmatmul.f32.gmra.mxu1 %v2969_v15 }
  0xd3   : > { %667 = vmatmul.f32.gmra.mxu2 %v2969_v15  ;;  %738 = vmatmul.f32.gmra.mxu3 %v2969_v15 }
  0xd7   : > { %v477_v19 = vpop.f32.mrf.mxu0  ;;  %v2976_v20 = vpop.f32.mrf.mxu1 }
  0xda   : > { %524 = vmatmul.f32.gmra.mxu0 %v2979_v21  ;;  %597 = vmatmul.f32.gmra.mxu1 %v2979_v21 }
  0xdb   : > { %670 = vmatmul.f32.gmra.mxu2 %v2979_v21  ;;  %741 = vmatmul.f32.gmra.mxu3 %v2979_v21 }
  0xde   : > { %v2985_v27 = vpop.f32.mrf.mxu2  ;;  %v696_v29 = vpop.f32.mrf.mxu3 }
  0xdf   : > { %v480_v30 = vpop.f32.mrf.mxu0  ;;  %v2987_v31 = vpop.f32.mrf.mxu1 }
  0xe2   : > { %526 = vmatmul.f32.gmra.mxu0 %v2990_v33  ;;  %599 = vmatmul.f32.gmra.mxu1 %v2990_v33 }
  0xe3   : > { %672 = vmatmul.f32.gmra.mxu2 %v2990_v33  ;;  %744 = vmatmul.f32.gmra.mxu3 %v2990_v33 }
  0xe6   : > { %v2997_v41 = vpop.f32.mrf.mxu2  ;;  %v698_v42 = vpop.f32.mrf.mxu3 }
  0xe7   : > { %v483_v44 = vpop.f32.mrf.mxu0  ;;  %v3001_v46 = vpop.f32.mrf.mxu1 }
  0xea   : > { %528 = vmatmul.f32.gmra.mxu0 %v2999_v43  ;;  %601 = vmatmul.f32.gmra.mxu1 %v2999_v43 }
  0xeb   : > { %674 = vmatmul.f32.gmra.mxu2 %v2999_v43  ;;  %747 = vmatmul.f32.gmra.mxu3 %v2999_v43 }
  0xee   : > { %v3007_v51 = vpop.f32.mrf.mxu2  ;;  %v700_v52 = vpop.f32.mrf.mxu3 }
  0xef   : > { %v3011_v55 = vadd.f32 %v700_v52, %v477_v19  ;;  %v486_v56 = vpop.f32.mrf.mxu0  ;;  %v3013_v57 = vpop.f32.mrf.mxu1  ;;  %v420_v52 = vld [vmem:[#allocation5 + $0x4c0] sm:$0xff] }
  0xf1   : > { %v3902_v10 = vrot.slane %v3011_v55, 7 }
  0xf2   : > { %530 = vmatmul.f32.gmra.mxu0 %v3009_v54  ;;  %603 = vmatmul.f32.gmra.mxu1 %v3009_v54 }
  0xf3   : > { %676 = vmatmul.f32.gmra.mxu2 %v3009_v54  ;;  %749 = vmatmul.f32.gmra.mxu3 %v3009_v54 }
  0xf6   : > { %v3021_v4 = vpop.f32.mrf.mxu2  ;;  %v703_v5 = vpop.f32.mrf.mxu3 }
  0xf7   : > { %v3023_v7 = vadd.f32 %v703_v5, %v480_v30  ;;  %v489_v8 = vpop.f32.mrf.mxu0  ;;  %v3025_v9 = vpop.f32.mrf.mxu1  ;;  %v432_v30 = vld [vmem:[#allocation5 + $0x520] sm:$0xff] }
  0xf8   : > { %1046 = vmatpush.msra.mxu0 %v432_v30 }
  0xf9   : > { %v1694_v12 = vrot.slane %v3023_v7, 7 }
  0xfa   : > { %768 = vmatmul.f32.vlgmr.msrb.gmra.mxu0 %v2860_v2  ;;  %841 = vmatmul.f32.vlgmr.msrb.gmra.mxu1 %v2860_v2 }
  0xfb   : > { %914 = vmatmul.f32.vlgmr.msrb.gmra.mxu2 %v2860_v2  ;;  %987 = vmatmul.f32.vlgmr.msrb.gmra.mxu3 %v2860_v2  ;;  %v3038_v18 = vsel %vm3915_vm0, %v3902_v10, %v1694_v12 }
  0xfc   : > { %1047 = vmatpush.msra.mxu0 %v420_v52 }
  0xfe   : > { %v3040_v19 = vpop.f32.mrf.mxu2  ;;  %v706_v22 = vpop.f32.mrf.mxu3  ;;  %1048 = vmatpush.msra.mxu0 %v408_v16  ;;  %v374_v16 = vld [vmem:[#allocation5 + $0x350] sm:$0xff] }
  0xff   : > { %v3042_v23 = vadd.f32 %v706_v22, %v483_v44  ;;  %v492_v25 = vpop.f32.mrf.mxu0  ;;  %v3044_v26 = vpop.f32.mrf.mxu1 }
 0x101   : > { %v1695_v29 = vrot.slane %v3042_v23, 7 }
 0x102   : > { %770 = vmatmul.f32.gmra.mxu0 %v2867_v14  ;;  %843 = vmatmul.f32.gmra.mxu1 %v2867_v14 }
 0x103   : > { %916 = vmatmul.f32.gmra.mxu2 %v2867_v14  ;;  %989 = vmatmul.f32.gmra.mxu3 %v2867_v14  ;;  %v3053_v36 = vsel %vm3915_vm0, %v1694_v12, %v1695_v29 }
 0x106   : > { %v3055_v38 = vpop.f32.mrf.mxu2  ;;  %v709_v39 = vpop.f32.mrf.mxu3 }
 0x107   : > { %v3057_v42 = vadd.f32 %v709_v39, %v486_v56  ;;  %v495_v44 = vpop.f32.mrf.mxu0  ;;  %v3059_v47 = vpop.f32.mrf.mxu1  ;;  %v386_v39 = vld [vmem:[#allocation5 + $0x3b0] sm:$0xff] }
 0x108   : > { %1196 = vmatpush.msra.mxu2 %v386_v39 }
 0x109   : > { %v1696_v48 = vrot.slane %v3057_v42, 7 }
 0x10a   : > { %772 = vmatmul.f32.gmra.mxu0 %v2878_v24  ;;  %845 = vmatmul.f32.gmra.mxu1 %v2878_v24 }
 0x10b   : > { %918 = vmatmul.f32.gmra.mxu2 %v2878_v24  ;;  %991 = vmatmul.f32.gmra.mxu3 %v2878_v24  ;;  %v3068_v56 = vsel %vm3915_vm0, %v1695_v29, %v1696_v48 }
 0x10c   : > { %1197 = vmatpush.msra.mxu2 %v374_v16 }
 0x10e   : > { %v3070_v62 = vpop.f32.mrf.mxu2  ;;  %v712_v63 = vpop.f32.mrf.mxu3 }
 0x10f   : > { %v3072_v0 = vadd.f32 %v712_v63, %v489_v8  ;;  %v498_v5 = vpop.f32.mrf.mxu0  ;;  %v3074_v12 = vpop.f32.mrf.mxu1 }
 0x111   : > { %v1697_v24 = vrot.slane %v3072_v0, 7 }
 0x112   : > { %775 = vmatmul.f32.gmra.mxu0 %v2885_v28  ;;  %848 = vmatmul.f32.gmra.mxu1 %v2885_v28 }
 0x113   : > { %921 = vmatmul.f32.gmra.mxu2 %v2885_v28  ;;  %994 = vmatmul.f32.gmra.mxu3 %v2885_v28  ;;  %v3083_v17 = vsel %vm3915_vm0, %v1696_v48, %v1697_v24  ;;  %v385_v28 = vld [vmem:[#allocation5 + $0x3a8] sm:$0xff]  ;;  %v396_v48 = vld [vmem:[#allocation5 + $0x400] sm:$0xff] }
 0x114   : > { %1123 = vmatpush.msra.mxu1 %v385_v28  ;;  %1049 = vmatpush.msra.mxu0 %v396_v48 }
 0x116   : > { %v3085_v8 = vpop.f32.mrf.mxu2  ;;  %v715_v22 = vpop.f32.mrf.mxu3 }
 0x117   : > { %v3087_v29 = vadd.f32 %v715_v22, %v492_v25  ;;  %v501_v30 = vpop.f32.mrf.mxu0  ;;  %v3089_v34 = vpop.f32.mrf.mxu1  ;;  %v375_v22 = vld [vmem:[#allocation5 + $0x358] sm:$0xff] }
 0x118   : > { %1270 = vmatpush.msra.mxu3 %v375_v22 }
 0x119   : > { %v1698_v35 = vrot.slane %v3087_v29, 7 }
 0x11a   : > { %778 = vmatmul.f32.gmra.mxu0 %v2892_v32  ;;  %851 = vmatmul.f32.gmra.mxu1 %v2892_v32 }
 0x11b   : > { %924 = vmatmul.f32.gmra.mxu2 %v2892_v32  ;;  %997 = vmatmul.f32.gmra.mxu3 %v2892_v32  ;;  %v3098_v25 = vsel %vm3915_vm0, %v1697_v24, %v1698_v35  ;;  %v373_v24 = vld [vmem:[#allocation5 + $0x348] sm:$0xff] }
 0x11c   : > { %1124 = vmatpush.msra.mxu1 %v373_v24 }
 0x11e   : > { %v3100_v52 = vpop.f32.mrf.mxu2  ;;  %v718_v59 = vpop.f32.mrf.mxu3 }
 0x11f   : > { %v3102_v60 = vadd.f32 %v718_v59, %v495_v44  ;;  %v504_v63 = vpop.f32.mrf.mxu0  ;;  %v3104_v13 = vpop.f32.mrf.mxu1 }
 0x120   : > { %3944 = vst [vmem:[#allocation18_spill] sm:$0xff] %v3104_v13  ;;  %v384_v13 = vld [vmem:[#allocation5 + $0x3a0] sm:$0xff] }
 0x121   : > { %v1699_v32 = vrot.slane %v3102_v60, 7  ;;  %1050 = vmatpush.msra.mxu0 %v384_v13  ;;  %v350_v13 = vld [vmem:[#allocation5 + $0x290] sm:$0xff] }
 0x122   : > { %781 = vmatmul.f32.gmra.mxu0 %v2899_v37  ;;  %854 = vmatmul.f32.gmra.mxu1 %v2899_v37 }
 0x123   : > { %927 = vmatmul.f32.gmra.mxu2 %v2899_v37  ;;  %1000 = vmatmul.f32.gmra.mxu3 %v2899_v37  ;;  %v3113_v44 = vsel %vm3915_vm0, %v1698_v35, %v1699_v32  ;;  %v362_v37 = vld [vmem:[#allocation5 + $0x2f0] sm:$0xff]  ;;  %v363_v35 = vld [vmem:[#allocation5 + $0x2f8] sm:$0xff] }
 0x124   : > { %1198 = vmatpush.msra.mxu2 %v362_v37  ;;  %1271 = vmatpush.msra.mxu3 %v363_v35 }
 0x126   : > { %v3115_v39 = vpop.f32.mrf.mxu2  ;;  %v721_v50 = vpop.f32.mrf.mxu3  ;;  %1199 = vmatpush.msra.mxu2 %v350_v13 }
 0x127   : > { %3945 = vst [vmem:[#allocation19_spill] sm:$0xff] %v3115_v39  ;;  %v3117_v28 = vadd.f32 %v721_v50, %v498_v5  ;;  %v507_v48 = vpop.f32.mrf.mxu0  ;;  %v3119_v59 = vpop.f32.mrf.mxu1 }
 0x128   : > { %3947 = vst [vmem:[#allocation21_spill] sm:$0xff] %v3119_v59 }
 0x129   : > { %3946 = vst [vmem:[#allocation20_spill] sm:$0xff] %v3117_v28  ;;  %v1700_v10 = vrot.slane %v3117_v28, 7  ;;  %v372_v28 = vld [vmem:[#allocation5 + $0x340] sm:$0xff] }
 0x12a   : > { %784 = vmatmul.f32.gmra.mxu0 %v2906_v40  ;;  %857 = vmatmul.f32.gmra.mxu1 %v2906_v40 }
 0x12b   : > { %930 = vmatmul.f32.gmra.mxu2 %v2906_v40  ;;  %1003 = vmatmul.f32.gmra.mxu3 %v2906_v40  ;;  %v3128_v5 = vsel %vm3915_vm0, %v1699_v32, %v1700_v10  ;;  %v361_v40 = vld [vmem:[#allocation5 + $0x2e8] sm:$0xff]  ;;  %v351_v32 = vld [vmem:[#allocation5 + $0x298] sm:$0xff] }
 0x12c   : > { %1125 = vmatpush.msra.mxu1 %v361_v40  ;;  %1051 = vmatpush.msra.mxu0 %v372_v28 }
 0x12d   : > { %1272 = vmatpush.msra.mxu3 %v351_v32 }
 0x12e   : > { %v3130_v16 = vpop.f32.mrf.mxu2  ;;  %v724_v22 = vpop.f32.mrf.mxu3 }
 0x12f   : > { %3948 = vst [vmem:[#allocation22_spill] sm:$0xff] %v3130_v16  ;;  %v3132_v24 = vadd.f32 %v724_v22, %v501_v30  ;;  %v510_v50 = vpop.f32.mrf.mxu0  ;;  %v3134_v59 = vpop.f32.mrf.mxu1 }
 0x130   : > { %3950 = vst [vmem:[#allocation24_spill] sm:$0xff] %v3134_v59 }
 0x131   : > { %3949 = vst [vmem:[#allocation23_spill] sm:$0xff] %v3132_v24  ;;  %v1701_v39 = vrot.slane %v3132_v24, 7  ;;  %v349_v24 = vld [vmem:[#allocation5 + $0x288] sm:$0xff] }
 0x132   : > { %787 = vmatmul.f32.gmra.mxu0 %v2913_v45  ;;  %860 = vmatmul.f32.gmra.mxu1 %v2913_v45 }
 0x133   : > { %933 = vmatmul.f32.gmra.mxu2 %v2913_v45  ;;  %1006 = vmatmul.f32.gmra.mxu3 %v2913_v45  ;;  %v3143_v30 = vsel %vm3915_vm0, %v1700_v10, %v1701_v39  ;;  %v360_v10 = vld [vmem:[#allocation5 + $0x2e0] sm:$0xff] }
 0x134   : > { %1126 = vmatpush.msra.mxu1 %v349_v24  ;;  %1052 = vmatpush.msra.mxu0 %v360_v10 }
 0x136   : > { %v3145_v37 = vpop.f32.mrf.mxu2  ;;  %v727_v35 = vpop.f32.mrf.mxu3 }
 0x137   : > { %3951 = vst [vmem:[#allocation25_spill] sm:$0xff] %v3145_v37  ;;  %v3147_v22 = vadd.f32 %v727_v35, %v504_v63  ;;  %v513_v59 = vpop.f32.mrf.mxu0  ;;  %v3149_v16 = vpop.f32.mrf.mxu1  ;;  %v338_v37 = vld [vmem:[#allocation5 + $0x230] sm:$0xff] }
 0x138   : > { %3953 = vst [vmem:[#allocation27_spill] sm:$0xff] %v3149_v16  ;;  %1200 = vmatpush.msra.mxu2 %v338_v37  ;;  %v325_v37 = vld [vmem:[#allocation5 + $0x1c8] sm:$0xff] }
 0x139   : > { %3952 = vst [vmem:[#allocation26_spill] sm:$0xff] %v3147_v22  ;;  %v1702_v45 = vrot.slane %v3147_v22, 7  ;;  %v339_v22 = vld [vmem:[#allocation5 + $0x238] sm:$0xff] }
 0x13a   : > { %790 = vmatmul.f32.gmra.mxu0 %v2920_v49  ;;  %863 = vmatmul.f32.gmra.mxu1 %v2920_v49 }
 0x13b   : > { %936 = vmatmul.f32.gmra.mxu2 %v2920_v49  ;;  %1009 = vmatmul.f32.gmra.mxu3 %v2920_v49  ;;  %v3158_v28 = vsel %vm3915_vm0, %v1701_v39, %v1702_v45  ;;  %v337_v49 = vld [vmem:[#allocation5 + $0x228] sm:$0xff]  ;;  %v348_v39 = vld [vmem:[#allocation5 + $0x280] sm:$0xff] }
 0x13c   : > { %3954 = vst [vmem:[#allocation28_spill] sm:$0xff] %v3158_v28  ;;  %1273 = vmatpush.msra.mxu3 %v339_v22  ;;  %1127 = vmatpush.msra.mxu1 %v337_v49  ;;  %v327_v28 = vld [vmem:[#allocation5 + $0x1d8] sm:$0xff]  ;;  %v336_v49 = vld [vmem:[#allocation5 + $0x220] sm:$0xff] }
 0x13d   : > { %1053 = vmatpush.msra.mxu0 %v348_v39 }
 0x13e   : > { %v3160_v63 = vpop.f32.mrf.mxu2  ;;  %v730_v40 = vpop.f32.mrf.mxu3  ;;  %1274 = vmatpush.msra.mxu3 %v327_v28  ;;  %1128 = vmatpush.msra.mxu1 %v325_v37  ;;  %v315_v28 = vld [vmem:[#allocation5 + $0x178] sm:$0xff] }
 0x13f   : > { %3955 = vst [vmem:[#allocation29_spill] sm:$0xff] %v3160_v63  ;;  %v3162_v13 = vadd.f32 %v730_v40, %v507_v48  ;;  %v516_v32 = vpop.f32.mrf.mxu0  ;;  %v3164_v35 = vpop.f32.mrf.mxu1  ;;  %1054 = vmatpush.msra.mxu0 %v336_v49 }
 0x140   : > { %3957 = vst [vmem:[#allocation31_spill] sm:$0xff] %v3164_v35  ;;  %1275 = vmatpush.msra.mxu3 %v315_v28 }
 0x141   : > { %3956 = vst [vmem:[#allocation30_spill] sm:$0xff] %v3162_v13  ;;  %v1703_v16 = vrot.slane %v3162_v13, 7  ;;  %v326_v13 = vld [vmem:[#allocation5 + $0x1d0] sm:$0xff] }
 0x142   : > { %793 = vmatmul.f32.gmra.mxu0 %v2927_v53  ;;  %866 = vmatmul.f32.gmra.mxu1 %v2927_v53 }
 0x143   : > { %939 = vmatmul.f32.gmra.mxu2 %v2927_v53  ;;  %1012 = vmatmul.f32.gmra.mxu3 %v2927_v53  ;;  %v3173_v48 = vsel %vm3915_vm0, %v1702_v45, %v1703_v16 }
 0x144   : > { %1201 = vmatpush.msra.mxu2 %v326_v13 }
 0x146   : > { %v3175_v24 = vpop.f32.mrf.mxu2  ;;  %v733_v10 = vpop.f32.mrf.mxu3 }
 0x147   : > { %v3177_v40 = vadd.f32 %v733_v10, %v510_v50  ;;  %v519_v35 = vpop.f32.mrf.mxu0  ;;  %v3179_v63 = vpop.f32.mrf.mxu1 }
 0x148   : > { %3958 = vst [vmem:[#allocation32_spill] sm:$0xff] %v3179_v63 }
 0x149   : > { %v1704_v53 = vrot.slane %v3177_v40, 7 }
 0x14a   : > { %796 = vmatmul.f32.gmra.mxu0 %v2934_v58  ;;  %869 = vmatmul.f32.gmra.mxu1 %v2934_v58 }
 0x14b   : > { %942 = vmatmul.f32.gmra.mxu2 %v2934_v58  ;;  %1015 = vmatmul.f32.gmra.mxu3 %v2934_v58  ;;  %v3188_v50 = vsel %vm3915_vm0, %v1703_v16, %v1704_v53  ;;  %v314_v16 = vld [vmem:[#allocation5 + $0x170] sm:$0xff] }
 0x14c   : > { %1202 = vmatpush.msra.mxu2 %v314_v16  ;;  %v303_v16 = vld [vmem:[#allocation5 + $0x118] sm:$0xff] }
 0x14d   : > { %1276 = vmatpush.msra.mxu3 %v303_v16  ;;  %v290_v16 = vld [vmem:[#allocation5 + $0xb0] sm:$0xff] }
 0x14e   : > { %v3190_v22 = vpop.f32.mrf.mxu2  ;;  %v736_v45 = vpop.f32.mrf.mxu3 }
 0x14f   : > { %3959 = vst [vmem:[#allocation33_spill] sm:$0xff] %v3190_v22  ;;  %v3192_v39 = vadd.f32 %v736_v45, %v513_v59  ;;  %v522_v10 = vpop.f32.mrf.mxu0  ;;  %v3194_v63 = vpop.f32.mrf.mxu1  ;;  %v313_v45 = vld [vmem:[#allocation5 + $0x168] sm:$0xff] }
 0x150   : > { %3961 = vst [vmem:[#allocation35_spill] sm:$0xff] %v3194_v63  ;;  %1129 = vmatpush.msra.mxu1 %v313_v45  ;;  %v301_v45 = vld [vmem:[#allocation5 + $0x108] sm:$0xff] }
 0x151   : > { %3960 = vst [vmem:[#allocation34_spill] sm:$0xff] %v3192_v39  ;;  %v1705_v58 = vrot.slane %v3192_v39, 7  ;;  %v324_v39 = vld [vmem:[#allocation5 + $0x1c0] sm:$0xff] }
 0x152   : > { %799 = vmatmul.f32.gmra.mxu0 %v2941_v61  ;;  %872 = vmatmul.f32.gmra.mxu1 %v2941_v61 }
 0x153   : > { %945 = vmatmul.f32.gmra.mxu2 %v2941_v61  ;;  %1018 = vmatmul.f32.gmra.mxu3 %v2941_v61  ;;  %v3203_v59 = vsel %vm3915_vm0, %v1704_v53, %v1705_v58  ;;  %v302_v53 = vld [vmem:[#allocation5 + $0x110] sm:$0xff] }
 0x154   : > { %1055 = vmatpush.msra.mxu0 %v324_v39  ;;  %1203 = vmatpush.msra.mxu2 %v302_v53 }
 0x155   : > { %1130 = vmatpush.msra.mxu1 %v301_v45 }
 0x156   : > { %v3205_v13 = vpop.f32.mrf.mxu2  ;;  %v739_v37 = vpop.f32.mrf.mxu3  ;;  %1204 = vmatpush.msra.mxu2 %v290_v16  ;;  %v300_v16 = vld [vmem:[#allocation5 + $0x100] sm:$0xff] }
 0x157   : > { %3962 = vst [vmem:[#allocation36_spill] sm:$0xff] %v3205_v13  ;;  %v3207_v49 = vadd.f32 %v739_v37, %v516_v32  ;;  %v525_v63 = vpop.f32.mrf.mxu0  ;;  %v598_v22 = vpop.f32.mrf.mxu1 }
 0x159   : > { %v1706_v61 = vrot.slane %v3207_v49, 7 }
 0x15a   : > { %802 = vmatmul.f32.gmra.mxu0 %v2948_v1  ;;  %875 = vmatmul.f32.gmra.mxu1 %v2948_v1 }
 0x15b   : > { %948 = vmatmul.f32.gmra.mxu2 %v2948_v1  ;;  %1021 = vmatmul.f32.gmra.mxu3 %v2948_v1  ;;  %v3216_v32 = vsel %vm3915_vm0, %v1705_v58, %v1706_v61  ;;  %v312_v1 = vld [vmem:[#allocation5 + $0x160] sm:$0xff] }
 0x15c   : > { %1056 = vmatpush.msra.mxu0 %v312_v1 }
 0x15e   : > { %v671_v63 = vpop.f32.mrf.mxu2  ;;  %v742_v22 = vpop.f32.mrf.mxu3  ;;  %1057 = vmatpush.msra.mxu0 %v300_v16 }
 0x15f   : > { %v3218_v39 = vadd.f32 %v742_v22, %v519_v35  ;;  %v527_v28 = vpop.f32.mrf.mxu0  ;;  %v600_v37 = vpop.f32.mrf.mxu1  ;;  %v291_v63 = vld [vmem:[#allocation5 + $0xb8] sm:$0xff] }
 0x160   : > { %1277 = vmatpush.msra.mxu3 %v291_v63 }
 0x161   : > { %v1707_v13 = vrot.slane %v3218_v39, 7 }
 0x162   : > { %805 = vmatmul.f32.gmra.mxu0 %v2955_v6  ;;  %878 = vmatmul.f32.gmra.mxu1 %v2955_v6 }
 0x163   : > { %951 = vmatmul.f32.gmra.mxu2 %v2955_v6  ;;  %1024 = vmatmul.f32.gmra.mxu3 %v2955_v6  ;;  %v3227_v58 = vsel %vm3915_vm0, %v1706_v61, %v1707_v13 }
 0x166   : > { %v673_v35 = vpop.f32.mrf.mxu2  ;;  %v745_v53 = vpop.f32.mrf.mxu3 }
 0x167   : > { %v3229_v22 = vadd.f32 %v745_v53, %v522_v10  ;;  %v529_v28 = vpop.f32.mrf.mxu0  ;;  %v602_v37 = vpop.f32.mrf.mxu1  ;;  %v289_v53 = vld [vmem:[#allocation5 + $0xa8] sm:$0xff] }
 0x168   : > { %1131 = vmatpush.msra.mxu1 %v289_v53  ;;  %v278_v37 = vld [vmem:[#allocation5 + $0x50] sm:$0xff] }
 0x169   : > { %v1708_v45 = vrot.slane %v3229_v22, 7  ;;  %1205 = vmatpush.msra.mxu2 %v278_v37 }
 0x16a   : > { %808 = vmatmul.f32.gmra.mxu0 %v2962_v11  ;;  %881 = vmatmul.f32.gmra.mxu1 %v2962_v11 }
 0x16b   : > { %954 = vmatmul.f32.gmra.mxu2 %v2962_v11  ;;  %1027 = vmatmul.f32.gmra.mxu3 %v2962_v11  ;;  %v3238_v6 = vsel %vm3915_vm0, %v1707_v13, %v1708_v45 }
 0x16e   : > { %v675_v10 = vpop.f32.mrf.mxu2  ;;  %v748_v61 = vpop.f32.mrf.mxu3 }
 0x16f   : > { %v531_v1 = vpop.f32.mrf.mxu0  ;;  %v604_v35 = vpop.f32.mrf.mxu1  ;;  %v279_v10 = vld [vmem:[#allocation5 + $0x58] sm:$0xff]  ;;  %v277_v61 = vld [vmem:[#allocation5 + $0x48] sm:$0xff] }
 0x170   : > { %1278 = vmatpush.msra.mxu3 %v279_v10  ;;  %v288_v1 = vld [vmem:[#allocation5 + $0xa0] sm:$0xff]  ;;  %1132 = vmatpush.msra.mxu1 %v277_v61  ;;  %v3963_v61 = vmov 0 }
 0x171   : > { %1058 = vmatpush.msra.mxu0 %v288_v1 }
 0x172   : > { %811 = vmatmul.f32.gmra.mxu0 %v2969_v15  ;;  %884 = vmatmul.f32.gmra.mxu1 %v2969_v15 }
 0x173   : > { %957 = vmatmul.f32.gmra.mxu2 %v2969_v15  ;;  %1030 = vmatmul.f32.gmra.mxu3 %v2969_v15 }
 0x176   : > { %v677_v11 = vpop.f32.mrf.mxu2  ;;  %v750_v63 = vpop.f32.mrf.mxu3 }
 0x177   : > { %v769_v13 = vpop.f32.mrf.mxu0  ;;  %v842_v28 = vpop.f32.mrf.mxu1  ;;  %v1454_v11 = vand.u32 15, %v3019_v3 }
 0x178   : > { %v3256_v13 = vld [vmem:[%s3892_s2] ss:$0 sm:$0xff] }
 0x179   : > { %vm3260_vm1 = vcmp.eq.s32.totalorder %v1454_v11, 0 }
 0x17a   : > { %814 = vmatmul.f32.gmra.mxu0 %v2979_v21  ;;  %887 = vmatmul.f32.gmra.mxu1 %v2979_v21  ;;  %v3964_v61 = vsel %vm3260_vm1, 4294967295, %v3963_v61 }
 0x17b   : > { %960 = vmatmul.f32.gmra.mxu2 %v2979_v21  ;;  %1033 = vmatmul.f32.gmra.mxu3 %v2979_v21  ;;  %3965 = vst [vmem:[#allocation37_spill] sm:$0xff] %v3964_v61 }
 0x17e   : > { %v915_v15 = vpop.f32.mrf.mxu2  ;;  %v988_v35 = vpop.f32.mrf.mxu3 }
 0x17f   : > { %v771_v53 = vpop.f32.mrf.mxu0  ;;  %v844_v16 = vpop.f32.mrf.mxu1  ;;  %v276_v15 = vld [vmem:[#allocation5 + $0x40] sm:$0xff] }
 0x180   : > { %1059 = vmatpush.msra.mxu0 %v276_v15 }
 0x182   : > { %817 = vmatmul.f32.gmra.mxu0 %v2990_v33  ;;  %890 = vmatmul.f32.gmra.mxu1 %v2990_v33 }
 0x183   : > { %963 = vmatmul.f32.gmra.mxu2 %v2990_v33  ;;  %1036 = vmatmul.f32.gmra.mxu3 %v2990_v33  ;;  %v3966_v33 = vrot.slane %v3011_v55, 7 }
 0x185   : > { %v1725_v1 = vsel %vm3915_vm0, %v1708_v45, %v3966_v33 }
 0x186   : > { %v917_v63 = vpop.f32.mrf.mxu2  ;;  %v990_v21 = vpop.f32.mrf.mxu3 }
 0x187   : > { %v773_v28 = vpop.f32.mrf.mxu0  ;;  %v846_v37 = vpop.f32.mrf.mxu1 }
 0x188   : > { %v1337_v10 = vadd.f32 %v773_v28, %v2976_v20  ;;  %v1758_v20 = vsel %vm3260_vm1, 0.0, %v1725_v1  ;;  %v3278_v53 = vadd.f32 %v846_v37, %v2985_v27  ;;  %v1436_v27 = vadd.s32 16, %v3019_v3 }
 0x189   : > { %vm4023_vm1 = vcmp.lt.s32.totalorder %v3019_v3, 7 }
 0x18a   : > { %v1677_v35 = vadd.f32 %v3256_v13, %v1337_v10  ;;  %893 = vmatmul.f32.gmra.mxu1 %v2999_v43  ;;  %820 = vmatmul.f32.gmra.mxu0 %v2999_v43  ;;  %v3911_v37 = vrot.slane %v3278_v53, 1 }
 0x18b   : > { %966 = vmatmul.f32.gmra.mxu2 %v2999_v43  ;;  %1039 = vmatmul.f32.gmra.mxu3 %v2999_v43 }
 0x18c   : > { %v1855_v45 = vadd.f32 %v1758_v20, %v1677_v35  ;;  %v1435_v20 = vadd.s32 8, %v3019_v3 }
 0x18e   : > { %v1871_v16 = vadd.f32 %v1855_v45, %v3278_v53  ;;  %v3281_v11 = vpop.f32.mrf.mxu2  ;;  %v3283_v63 = vpop.f32.mrf.mxu3 }
 0x18f   : > { %3967 = vst [vmem:[#allocation38_spill] sm:$0xff] %v3281_v11  ;;  %v776_v21 = vpop.f32.mrf.mxu0  ;;  %v849_v28 = vpop.f32.mrf.mxu1  ;;  %v1461_v11 = vand.u32 15, %v1435_v20 }
 0x190   : > { %3968 = vst [vmem:[#allocation39_spill] sm:$0xff] %v3283_v63  ;;  %v1340_v10 = vadd.f32 %v776_v21, %v2987_v31  ;;  %v1341_v33 = vadd.f32 %v849_v28, %v2997_v41  ;;  %v1887_v31 = vadd.f32 %v1677_v35, %v3011_v55 }
 0x191   : > { %2095 = vst [vmem:[%s3285_s30] sm:$0xff] %v1871_v16  ;;  %v1468_v16 = vand.u32 15, %v1436_v27  ;;  %vm3320_vm4 = vcmp.eq.s32.totalorder %v1461_v11, 15 }
 0x192   : > { %v1678_v1 = vadd.f32 %v3256_v13, %v1340_v10  ;;  %v1775_v15 = vrot.slane %v1341_v33, 1  ;;  %895 = vmatmul.f32.gmra.mxu1 %v3009_v54  ;;  %822 = vmatmul.f32.gmra.mxu0 %v3009_v54 }
 0x193   : > { %968 = vmatmul.f32.gmra.mxu2 %v3009_v54  ;;  %1041 = vmatmul.f32.gmra.mxu3 %v3009_v54  ;;  %vm3313_vm3 = vcmp.eq.s32.totalorder %v1468_v16, 0 }
 0x194   : > { %v1805_v41 = vsel %vm3917_vm2, %v3911_v37, %v1775_v15  ;;  %v1856_v45 = vadd.f32 %v3038_v18, %v1678_v1 }
 0x195   : > { %v1903_v21 = vadd.f32 %v1887_v31, %v1805_v41 }
 0x196   : > { %v1872_v28 = vadd.f32 %v1856_v45, %v1341_v33  ;;  %v3305_v10 = vpop.f32.mrf.mxu2  ;;  %v3307_v61 = vpop.f32.mrf.mxu3 }
 0x197   : > { %2111 = vst [vmem:[%s3285_s30 + $0x8] sm:$0xff] %v1903_v21  ;;  %v779_v55 = vpop.f32.mrf.mxu0  ;;  %v852_v35 = vpop.f32.mrf.mxu1 }
 0x198   : > { %2096 = vst [vmem:[%s3285_s30 + $0x10] sm:$0xff] %v1872_v28  ;;  %v1343_v63 = vadd.f32 %v779_v55, %v3001_v46  ;;  %v1344_v54 = vadd.f32 %v852_v35, %v3007_v51  ;;  %v1760_v46 = vsel %vm3313_vm3, 0.0, %v3053_v36  ;;  %v1888_v51 = vadd.f32 %v1678_v1, %v3023_v7 }
 0x199   : > { %v1438_v1 = vadd.s32 32, %v3019_v3 }
 0x19a   : > { %v1679_v18 = vadd.f32 %v3256_v13, %v1343_v63  ;;  %v1776_v33 = vrot.slane %v1344_v54, 1  ;;  %1133 = vmatmul.f32.vlgmr.msra.gmra.mxu1 %v2860_v2  ;;  %1060 = vmatmul.f32.vlgmr.msra.gmra.mxu0 %v2860_v2 }
 0x19b   : > { %1206 = vmatmul.f32.vlgmr.msra.gmra.mxu2 %v2860_v2  ;;  %1279 = vmatmul.f32.vlgmr.msra.gmra.mxu3 %v2860_v2  ;;  %v1482_v35 = vand.u32 15, %v1438_v1 }
 0x19c   : > { %v1804_v63 = vsel %vm3917_vm2, %v1775_v15, %v1776_v33  ;;  %v1857_v20 = vadd.f32 %v1760_v46, %v1679_v18  ;;  %v1889_v55 = vadd.f32 %v1679_v18, %v3042_v23 }
 0x19d   : > { %v1840_v11 = vsel %vm3320_vm4, 0.0, %v1804_v63  ;;  %vm3361_vm5 = vcmp.eq.s32.totalorder %v1482_v35, 0 }
 0x19e   : > { %v1873_v31 = vadd.f32 %v1857_v20, %v1344_v54  ;;  %v3334_v41 = vpop.f32.mrf.mxu2  ;;  %v3336_v45 = vpop.f32.mrf.mxu3  ;;  %v1904_v36 = vadd.f32 %v1888_v51, %v1840_v11  ;;  %v1437_v54 = vadd.s32 24, %v3019_v3 }
 0x19f   : > { %v782_v16 = vpop.f32.mrf.mxu0  ;;  %v855_v21 = vpop.f32.mrf.mxu1 }
 0x1a0   : > { %2097 = vst [vmem:[%s3285_s30 + $0x40] sm:$0xff] %v1873_v31  ;;  %v1346_v2 = vadd.f32 %v782_v16, %v3013_v57  ;;  %v1347_v7 = vadd.f32 %v855_v21, %v3021_v4  ;;  %v1475_v11 = vand.u32 15, %v1437_v54  ;;  %v2461_v16 = vld [vmem:[%s2875_s23] sm:$0xff] }
 0x1a1   : > { %2112 = vst [vmem:[%s3285_s30 + $0x18] sm:$0xff] %v1904_v36  ;;  %v3701_v21 = vld [vmem:[%s3892_s2] ss:$0 sm:$0xff] }
 0x1a2   : > { %v1680_v15 = vadd.f32 %v3256_v13, %v1346_v2  ;;  %v1777_v28 = vrot.slane %v1347_v7, 1  ;;  %1135 = vmatmul.f32.gmra.mxu1 %v2867_v14  ;;  %1062 = vmatmul.f32.gmra.mxu0 %v2867_v14  ;;  %vm3367_vm6 = vcmp.eq.s32.totalorder %v1475_v11, 15  ;;  %v2462_v11 = vld [vmem:[%s2875_s23 + $0x8] sm:$0xff] }
 0x1a3   : > { %1208 = vmatmul.f32.gmra.mxu2 %v2867_v14  ;;  %1281 = vmatmul.f32.gmra.mxu3 %v2867_v14 }
 0x1a4   : > { %v1803_v57 = vsel %vm3917_vm2, %v1776_v33, %v1777_v28  ;;  %v1858_v4 = vadd.f32 %v3068_v56, %v1680_v15 }
 0x1a5   : > { %v1905_v46 = vadd.f32 %v1889_v55, %v1803_v57 }
 0x1a6   : > { %v1874_v51 = vadd.f32 %v1858_v4, %v1347_v7  ;;  %v3353_v63 = vpop.f32.mrf.mxu2  ;;  %v3355_v20 = vpop.f32.mrf.mxu3 }
 0x1a7   : > { %2113 = vst [vmem:[%s3285_s30 + $0x48] sm:$0xff] %v1905_v46  ;;  %v785_v23 = vpop.f32.mrf.mxu0  ;;  %v858_v18 = vpop.f32.mrf.mxu1 }
 0x1a8   : > { %2098 = vst [vmem:[%s3285_s30 + $0x50] sm:$0xff] %v1874_v51  ;;  %v1349_v14 = vadd.f32 %v785_v23, %v3025_v9  ;;  %v1350_v31 = vadd.f32 %v858_v18, %v3040_v19  ;;  %v1762_v9 = vsel %vm3361_vm5, 0.0, %v3083_v17  ;;  %v1890_v19 = vadd.f32 %v1680_v15, %v3057_v42 }
 0x1a9   : > { %v1440_v15 = vadd.s32 48, %v3019_v3  ;;  %v1439_v23 = vadd.s32 40, %v3019_v3 }
 0x1aa   : > { %v1681_v56 = vadd.f32 %v3256_v13, %v1349_v14  ;;  %v1778_v36 = vrot.slane %v1350_v31, 1  ;;  %1137 = vmatmul.f32.gmra.mxu1 %v2461_v16  ;;  %1064 = vmatmul.f32.gmra.mxu0 %v2461_v16 }
 0x1ab   : > { %1210 = vmatmul.f32.gmra.mxu2 %v2461_v16  ;;  %1283 = vmatmul.f32.gmra.mxu3 %v2461_v16  ;;  %v1496_v14 = vand.u32 15, %v1440_v15 }
 0x1ac   : > { %v1802_v2 = vsel %vm3917_vm2, %v1777_v28, %v1778_v36  ;;  %v1859_v7 = vadd.f32 %v1762_v9, %v1681_v56  ;;  %v1891_v18 = vadd.f32 %v1681_v56, %v3072_v0 }
 0x1ad   : > { %v1842_v1 = vsel %vm3367_vm6, 0.0, %v1802_v2  ;;  %v1489_v2 = vand.u32 15, %v1439_v23  ;;  %vm3403_vm7 = vcmp.eq.s32.totalorder %v1496_v14, 0 }
 0x1ae   : > { %v1875_v54 = vadd.f32 %v1859_v7, %v1350_v31  ;;  %v3379_v55 = vpop.f32.mrf.mxu2  ;;  %v3381_v57 = vpop.f32.mrf.mxu3  ;;  %v1906_v4 = vadd.f32 %v1890_v19, %v1842_v1 }
 0x1af   : > { %v788_v17 = vpop.f32.mrf.mxu0  ;;  %v861_v35 = vpop.f32.mrf.mxu1  ;;  %vm3409_vm8 = vcmp.eq.s32.totalorder %v1489_v2, 15 }
 0x1b0   : > { %2099 = vst [vmem:[%s3285_s30 + $0x80] sm:$0xff] %v1875_v54  ;;  %v1352_v46 = vadd.f32 %v788_v17, %v3044_v26  ;;  %v1353_v42 = vadd.f32 %v861_v35, %v3055_v38 }
 0x1b1   : > { %2114 = vst [vmem:[%s3285_s30 + $0x58] sm:$0xff] %v1906_v4  ;;  %v2463_v4 = vld [vmem:[%s2875_s23 + $0x10] sm:$0xff] }
 0x1b2   : > { %v1682_v28 = vadd.f32 %v3256_v13, %v1352_v46  ;;  %v1779_v51 = vrot.slane %v1353_v42, 1  ;;  %1139 = vmatmul.f32.gmra.mxu1 %v2462_v11  ;;  %1067 = vmatmul.f32.gmra.mxu0 %v2462_v11 }
 0x1b3   : > { %1212 = vmatmul.f32.gmra.mxu2 %v2462_v11  ;;  %1285 = vmatmul.f32.gmra.mxu3 %v2462_v11 }
 0x1b4   : > { %v1801_v26 = vsel %vm3917_vm2, %v1778_v36, %v1779_v51  ;;  %v1860_v38 = vadd.f32 %v3098_v25, %v1682_v28 }
 0x1b5   : > { %v1907_v31 = vadd.f32 %v1891_v18, %v1801_v26 }
 0x1b6   : > { %v1876_v16 = vadd.f32 %v1860_v38, %v1353_v42  ;;  %v3395_v9 = vpop.f32.mrf.mxu2  ;;  %v3397_v19 = vpop.f32.mrf.mxu3 }
 0x1b7   : > { %2115 = vst [vmem:[%s3285_s30 + $0x88] sm:$0xff] %v1907_v31  ;;  %v791_v7 = vpop.f32.mrf.mxu0  ;;  %v864_v1 = vpop.f32.mrf.mxu1  ;;  %v2464_v31 = vld [vmem:[%s2875_s23 + $0x18] sm:$0xff] }
 0x1b8   : > { %2100 = vst [vmem:[%s3285_s30 + $0x90] sm:$0xff] %v1876_v16  ;;  %v1355_v0 = vadd.f32 %v791_v7, %v3059_v47  ;;  %v1356_v56 = vadd.f32 %v864_v1, %v3070_v62  ;;  %v1764_v47 = vsel %vm3403_vm7, 0.0, %v3113_v44  ;;  %v1892_v62 = vadd.f32 %v1682_v28, %v3087_v29 }
 0x1b9   : > { %v1442_v28 = vadd.s32 64, %v3019_v3  ;;  %v1441_v16 = vadd.s32 56, %v3019_v3 }
 0x1ba   : > { %v1683_v25 = vadd.f32 %v3256_v13, %v1355_v0  ;;  %v1780_v54 = vrot.slane %v1356_v56, 1  ;;  %1141 = vmatmul.f32.gmra.mxu1 %v2463_v4  ;;  %1070 = vmatmul.f32.gmra.mxu0 %v2463_v4 }
 0x1bb   : > { %1214 = vmatmul.f32.gmra.mxu2 %v2463_v4  ;;  %1287 = vmatmul.f32.gmra.mxu3 %v2463_v4  ;;  %v1510_v7 = vand.u32 15, %v1442_v28 }
 0x1bc   : > { %v1800_v35 = vsel %vm3917_vm2, %v1779_v51, %v1780_v54  ;;  %v1861_v46 = vadd.f32 %v1764_v47, %v1683_v25  ;;  %v1893_v2 = vadd.f32 %v1683_v25, %v3102_v60  ;;  %v1503_v47 = vand.u32 15, %v1441_v16 }
 0x1bd   : > { %v1844_v42 = vsel %vm3409_vm8, 0.0, %v1800_v35  ;;  %vm3445_vm9 = vcmp.eq.s32.totalorder %v1510_v7, 0 }
 0x1be   : > { %v1877_v15 = vadd.f32 %v1861_v46, %v1356_v56  ;;  %v3421_v11 = vpop.f32.mrf.mxu2  ;;  %v3423_v23 = vpop.f32.mrf.mxu3  ;;  %v1908_v18 = vadd.f32 %v1892_v62, %v1844_v42  ;;  %v2465_v42 = vld [vmem:[%s2875_s23 + $0x20] sm:$0xff]  ;;  %vm3451_vm10 = vcmp.eq.s32.totalorder %v1503_v47, 15  ;;  %v2466_v47 = vld [vmem:[%s2875_s23 + $0x28] sm:$0xff] }
 0x1bf   : > { %v794_v44 = vpop.f32.mrf.mxu0  ;;  %v867_v26 = vpop.f32.mrf.mxu1 }
 0x1c0   : > { %2101 = vst [vmem:[%s3285_s30 + $0xc0] sm:$0xff] %v1877_v15  ;;  %v1358_v38 = vadd.f32 %v794_v44, %v3074_v12  ;;  %v1359_v29 = vadd.f32 %v867_v26, %v3085_v8 }
 0x1c1   : > { %2116 = vst [vmem:[%s3285_s30 + $0x98] sm:$0xff] %v1908_v18 }
 0x1c2   : > { %v1684_v51 = vadd.f32 %v3256_v13, %v1358_v38  ;;  %v1781_v14 = vrot.slane %v1359_v29, 1  ;;  %1144 = vmatmul.f32.gmra.mxu1 %v2464_v31  ;;  %1073 = vmatmul.f32.gmra.mxu0 %v2464_v31 }
 0x1c3   : > { %1217 = vmatmul.f32.gmra.mxu2 %v2464_v31  ;;  %1290 = vmatmul.f32.gmra.mxu3 %v2464_v31 }
 0x1c4   : > { %v1799_v12 = vsel %vm3917_vm2, %v1780_v54, %v1781_v14  ;;  %v1862_v8 = vadd.f32 %v3128_v5, %v1684_v51 }
 0x1c5   : > { %v1909_v1 = vadd.f32 %v1893_v2, %v1799_v12  ;;  %v3986_v12 = vld [vmem:[#allocation18_spill] sm:$0xff] }
 0x1c6   : > { %v1878_v0 = vadd.f32 %v1862_v8, %v1359_v29  ;;  %v3437_v56 = vpop.f32.mrf.mxu2  ;;  %v3439_v4 = vpop.f32.mrf.mxu3 }
 0x1c7   : > { %2117 = vst [vmem:[%s3285_s30 + $0xc8] sm:$0xff] %v1909_v1  ;;  %v797_v62 = vpop.f32.mrf.mxu0  ;;  %v870_v35 = vpop.f32.mrf.mxu1 }
 0x1c8   : > { %2102 = vst [vmem:[%s3285_s30 + $0xd0] sm:$0xff] %v1878_v0  ;;  %v1361_v60 = vadd.f32 %v797_v62, %v3089_v34  ;;  %v1362_v25 = vadd.f32 %v870_v35, %v3100_v52  ;;  %v1766_v34 = vsel %vm3445_vm9, 0.0, %v3143_v30  ;;  %v3985_v52 = vld [vmem:[#allocation20_spill] sm:$0xff]  ;;  %v1443_v62 = vadd.s32 72, %v3019_v3  ;;  %v3988_v35 = vld [vmem:[#allocation23_spill] sm:$0xff] }
 0x1c9   : > { %v1894_v18 = vadd.f32 %v1684_v51, %v3985_v52  ;;  %v3987_v51 = vld [vmem:[#allocation19_spill] sm:$0xff] }
 0x1ca   : > { %v1685_v5 = vadd.f32 %v3256_v13, %v1361_v60  ;;  %v1782_v46 = vrot.slane %v1362_v25, 1  ;;  %1147 = vmatmul.f32.gmra.mxu1 %v2465_v42  ;;  %1076 = vmatmul.f32.gmra.mxu0 %v2465_v42 }
 0x1cb   : > { %1220 = vmatmul.f32.gmra.mxu2 %v2465_v42  ;;  %1293 = vmatmul.f32.gmra.mxu3 %v2465_v42  ;;  %v3989_v42 = vld [vmem:[#allocation28_spill] sm:$0xff] }
 0x1cc   : > { %v1798_v44 = vsel %vm3917_vm2, %v1781_v14, %v1782_v46  ;;  %v1863_v26 = vadd.f32 %v1766_v34, %v1685_v5  ;;  %v1444_v14 = vadd.s32 80, %v3019_v3  ;;  %v1895_v60 = vadd.f32 %v1685_v5, %v3988_v35  ;;  %v3990_v5 = vld [vmem:[#allocation21_spill] sm:$0xff]  ;;  %v3997_v35 = vld [vmem:[#allocation26_spill] sm:$0xff] }
 0x1cd   : > { %v1846_v38 = vsel %vm3451_vm10, 0.0, %v1798_v44 }
 0x1ce   : > { %v1879_v29 = vadd.f32 %v1863_v26, %v1362_v25  ;;  %v3463_v28 = vpop.f32.mrf.mxu2  ;;  %v3465_v31 = vpop.f32.mrf.mxu3  ;;  %v1910_v16 = vadd.f32 %v1894_v18, %v1846_v38  ;;  %v1524_v52 = vand.u32 15, %v1444_v14  ;;  %v2467_v14 = vld [vmem:[%s2875_s23 + $0x30] sm:$0xff] }
 0x1cf   : > { %v800_v30 = vpop.f32.mrf.mxu0  ;;  %v873_v2 = vpop.f32.mrf.mxu1 }
 0x1d0   : > { %2103 = vst [vmem:[%s3285_s30 + $0x100] sm:$0xff] %v1879_v29  ;;  %v1364_v8 = vadd.f32 %v800_v30, %v3986_v12  ;;  %v1365_v7 = vadd.f32 %v873_v2, %v3987_v51  ;;  %v1517_v29 = vand.u32 15, %v1443_v62  ;;  %v3991_v12 = vld [vmem:[#allocation22_spill] sm:$0xff]  ;;  %vm3487_vm11 = vcmp.eq.s32.totalorder %v1524_v52, 0 }
 0x1d1   : > { %2118 = vst [vmem:[%s3285_s30 + $0xd8] sm:$0xff] %v1910_v16  ;;  %v1768_v62 = vsel %vm3487_vm11, 0.0, %v3173_v48 }
 0x1d2   : > { %v1686_v1 = vadd.f32 %v3256_v13, %v1364_v8  ;;  %v1783_v0 = vrot.slane %v1365_v7, 1  ;;  %1150 = vmatmul.f32.gmra.mxu1 %v2466_v47  ;;  %1079 = vmatmul.f32.gmra.mxu0 %v2466_v47  ;;  %vm3493_vm12 = vcmp.eq.s32.totalorder %v1517_v29, 15 }
 0x1d3   : > { %1223 = vmatmul.f32.gmra.mxu2 %v2466_v47  ;;  %1296 = vmatmul.f32.gmra.mxu3 %v2466_v47  ;;  %v3994_v47 = vmov 0 }
 0x1d4   : > { %v1797_v25 = vsel %vm3917_vm2, %v1782_v46, %v1783_v0  ;;  %v1864_v34 = vadd.f32 %v3989_v42, %v1686_v1  ;;  %v3995_v47 = vsel %vm3493_vm12, 4294967295, %v3994_v47 }
 0x1d5   : > { %v1911_v18 = vadd.f32 %v1895_v60, %v1797_v25  ;;  %3996 = vst [vmem:[#allocation20_spill] sm:$0xff] %v3995_v47  ;;  %v1896_v60 = vadd.f32 %v1686_v1, %v3997_v35  ;;  %v3999_v1 = vld [vmem:[#allocation25_spill] sm:$0xff]  ;;  %v4000_v35 = vld [vmem:[#allocation30_spill] sm:$0xff] }
 0x1d6   : > { %v1880_v44 = vadd.f32 %v1864_v34, %v1365_v7  ;;  %v3479_v26 = vpop.f32.mrf.mxu2  ;;  %v3481_v38 = vpop.f32.mrf.mxu3 }
 0x1d7   : > { %2119 = vst [vmem:[%s3285_s30 + $0x108] sm:$0xff] %v1911_v18  ;;  %v803_v16 = vpop.f32.mrf.mxu0  ;;  %v876_v30 = vpop.f32.mrf.mxu1 }
 0x1d8   : > { %2104 = vst [vmem:[%s3285_s30 + $0x110] sm:$0xff] %v1880_v44  ;;  %v1367_v2 = vadd.f32 %v803_v16, %v3990_v5  ;;  %v1368_v8 = vadd.f32 %v876_v30, %v3991_v12  ;;  %v3998_v30 = vld [vmem:[#allocation24_spill] sm:$0xff] }
 0x1da   : > { %v1687_v51 = vadd.f32 %v3256_v13, %v1367_v2  ;;  %v1784_v7 = vrot.slane %v1368_v8, 1  ;;  %1153 = vmatmul.f32.gmra.mxu1 %v2467_v14  ;;  %1082 = vmatmul.f32.gmra.mxu0 %v2467_v14 }
 0x1db   : > { %1226 = vmatmul.f32.gmra.mxu2 %v2467_v14  ;;  %1299 = vmatmul.f32.gmra.mxu3 %v2467_v14 }
 0x1dc   : > { %v1796_v25 = vsel %vm3917_vm2, %v1783_v0, %v1784_v7  ;;  %v1865_v42 = vadd.f32 %v1768_v62, %v1687_v51  ;;  %v1446_v0 = vadd.s32 96, %v3019_v3  ;;  %v1445_v62 = vadd.s32 88, %v3019_v3 }
 0x1dd   : > { %v1848_v34 = vsel %vm3493_vm12, 0.0, %v1796_v25 }
 0x1de   : > { %v1881_v52 = vadd.f32 %v1865_v42, %v1368_v8  ;;  %v3505_v18 = vpop.f32.mrf.mxu2  ;;  %v3507_v44 = vpop.f32.mrf.mxu3  ;;  %v1912_v29 = vadd.f32 %v1896_v60, %v1848_v34  ;;  %v2468_v8 = vld [vmem:[%s2875_s23 + $0x38] sm:$0xff]  ;;  %v1897_v60 = vadd.f32 %v1687_v51, %v4000_v35  ;;  %v1538_v34 = vand.u32 15, %v1446_v0  ;;  %v4001_v51 = vld [vmem:[#allocation27_spill] sm:$0xff]  ;;  %v4002_v35 = vld [vmem:[#allocation29_spill] sm:$0xff] }
 0x1df   : > { %v806_v48 = vpop.f32.mrf.mxu0  ;;  %v879_v16 = vpop.f32.mrf.mxu1  ;;  %v2469_v0 = vld [vmem:[%s2875_s23 + $0x40] sm:$0xff] }
 0x1e0   : > { %2105 = vst [vmem:[%s3285_s30 + $0x140] sm:$0xff] %v1881_v52  ;;  %v1370_v5 = vadd.f32 %v806_v48, %v3998_v30  ;;  %v1371_v2 = vadd.f32 %v879_v16, %v3999_v1  ;;  %v1531_v30 = vand.u32 15, %v1445_v62  ;;  %vm3529_vm13 = vcmp.eq.s32.totalorder %v1538_v34, 0 }
 0x1e1   : > { %2120 = vst [vmem:[%s3285_s30 + $0x118] sm:$0xff] %v1912_v29  ;;  %v4006_v62 = vmov 0 }
 0x1e2   : > { %v1688_v12 = vadd.f32 %v3256_v13, %v1370_v5  ;;  %v1785_v14 = vrot.slane %v1371_v2, 1  ;;  %1156 = vmatmul.f32.gmra.mxu1 %v2468_v8  ;;  %1085 = vmatmul.f32.gmra.mxu0 %v2468_v8  ;;  %vm3535_vm14 = vcmp.eq.s32.totalorder %v1531_v30, 15 }
 0x1e3   : > { %1229 = vmatmul.f32.gmra.mxu2 %v2468_v8  ;;  %1302 = vmatmul.f32.gmra.mxu3 %v2468_v8  ;;  %v4007_v62 = vsel %vm3535_vm14, 4294967295, %v4006_v62 }
 0x1e4   : > { %v1795_v25 = vsel %vm3917_vm2, %v1784_v7, %v1785_v14  ;;  %v1866_v42 = vadd.f32 %v3188_v50, %v1688_v12  ;;  %v4003_v7 = vmov 0  ;;  %4008 = vst [vmem:[#allocation19_spill] sm:$0xff] %v4007_v62 }
 0x1e5   : > { %v1913_v52 = vadd.f32 %v1897_v60, %v1795_v25  ;;  %v4004_v7 = vsel %vm3529_vm13, 4294967295, %v4003_v7  ;;  %v1770_v60 = vsel %vm3529_vm13, 0.0, %v3203_v59  ;;  %v1898_v25 = vadd.f32 %v1688_v12, %v3177_v40 }
 0x1e6   : > { %v1882_v29 = vadd.f32 %v1866_v42, %v1371_v2  ;;  %v3521_v48 = vpop.f32.mrf.mxu2  ;;  %v3523_v16 = vpop.f32.mrf.mxu3  ;;  %4005 = vst [vmem:[#allocation18_spill] sm:$0xff] %v4004_v7  ;;  %v1448_v12 = vadd.s32 112, %v3019_v3 }
 0x1e7   : > { %2121 = vst [vmem:[%s3285_s30 + $0x148] sm:$0xff] %v1913_v52  ;;  %v809_v5 = vpop.f32.mrf.mxu0  ;;  %v882_v1 = vpop.f32.mrf.mxu1 }
 0x1e8   : > { %2106 = vst [vmem:[%s3285_s30 + $0x150] sm:$0xff] %v1882_v29  ;;  %v1373_v8 = vadd.f32 %v809_v5, %v4001_v51  ;;  %v1374_v47 = vadd.f32 %v882_v1, %v4002_v35 }
 0x1ea   : > { %v1689_v50 = vadd.f32 %v3256_v13, %v1373_v8  ;;  %v1786_v2 = vrot.slane %v1374_v47, 1  ;;  %1159 = vmatmul.f32.gmra.mxu1 %v2469_v0  ;;  %1088 = vmatmul.f32.gmra.mxu0 %v2469_v0  ;;  %v4009_v8 = vld [vmem:[#allocation31_spill] sm:$0xff] }
 0x1eb   : > { %1232 = vmatmul.f32.gmra.mxu2 %v2469_v0  ;;  %1305 = vmatmul.f32.gmra.mxu3 %v2469_v0 }
 0x1ec   : > { %v1794_v42 = vsel %vm3917_vm2, %v1785_v14, %v1786_v2  ;;  %v1867_v34 = vadd.f32 %v1770_v60, %v1689_v50  ;;  %v1447_v60 = vadd.s32 104, %v3019_v3 }
 0x1ed   : > { %v1850_v52 = vsel %vm3535_vm14, 0.0, %v1794_v42 }
 0x1ee   : > { %v1883_v29 = vadd.f32 %v1867_v34, %v1374_v47  ;;  %v3547_v30 = vpop.f32.mrf.mxu2  ;;  %v3549_v5 = vpop.f32.mrf.mxu3  ;;  %v1914_v1 = vadd.f32 %v1898_v25, %v1850_v52  ;;  %v2470_v47 = vld [vmem:[%s2875_s23 + $0x48] sm:$0xff]  ;;  %v1552_v52 = vand.u32 15, %v1448_v12 }
 0x1ef   : > { %v812_v59 = vpop.f32.mrf.mxu0  ;;  %v885_v51 = vpop.f32.mrf.mxu1  ;;  %v4010_v25 = vld [vmem:[#allocation34_spill] sm:$0xff] }
 0x1f0   : > { %2107 = vst [vmem:[%s3285_s30 + $0x180] sm:$0xff] %v1883_v29  ;;  %v1376_v35 = vadd.f32 %v812_v59, %v4009_v8  ;;  %v1377_v40 = vadd.f32 %v885_v51, %v3175_v24  ;;  %v1899_v42 = vadd.f32 %v1689_v50, %v4010_v25  ;;  %v1545_v8 = vand.u32 15, %v1447_v60  ;;  %v4011_v50 = vld [vmem:[#allocation32_spill] sm:$0xff]  ;;  %v4012_v25 = vld [vmem:[#allocation33_spill] sm:$0xff]  ;;  %v2471_v60 = vld [vmem:[%s2875_s23 + $0x50] sm:$0xff] }
 0x1f1   : > { %2122 = vst [vmem:[%s3285_s30 + $0x158] sm:$0xff] %v1914_v1  ;;  %vm3571_vm15 = vcmp.eq.s32.totalorder %v1552_v52, 0 }
 0x1f2   : > { %v1690_v14 = vadd.f32 %v3256_v13, %v1376_v35  ;;  %v1787_v0 = vrot.slane %v1377_v40, 1  ;;  %1162 = vmatmul.f32.gmra.mxu1 %v2470_v47  ;;  %1091 = vmatmul.f32.gmra.mxu0 %v2470_v47  ;;  %vm3576_vm0 = vcmp.eq.s32.totalorder %v1545_v8, 15 }
 0x1f3   : > { %1235 = vmatmul.f32.gmra.mxu2 %v2470_v47  ;;  %1308 = vmatmul.f32.gmra.mxu3 %v2470_v47 }
 0x1f4   : > { %v1793_v24 = vsel %vm3917_vm2, %v1786_v2, %v1787_v0  ;;  %v1868_v34 = vadd.f32 %v3216_v32, %v1690_v14  ;;  %v4013_v2 = vmov 0 }
 0x1f5   : > { %v1915_v29 = vadd.f32 %v1899_v42, %v1793_v24  ;;  %v4014_v2 = vsel %vm3571_vm15, 4294967295, %v4013_v2  ;;  %v1449_v42 = vadd.s32 120, %v3019_v3  ;;  %v1900_v24 = vadd.f32 %v1690_v14, %v3207_v49  ;;  %v4019_v14 = vld [vmem:[#allocation36_spill] sm:$0xff] }
 0x1f6   : > { %v1884_v1 = vadd.f32 %v1868_v34, %v1377_v40  ;;  %v3563_v59 = vpop.f32.mrf.mxu2  ;;  %v3565_v51 = vpop.f32.mrf.mxu3  ;;  %4015 = vst [vmem:[#allocation23_spill] sm:$0xff] %v4014_v2  ;;  %v4016_v40 = vmov 0 }
 0x1f7   : > { %2123 = vst [vmem:[%s3285_s30 + $0x188] sm:$0xff] %v1915_v29  ;;  %v815_v35 = vpop.f32.mrf.mxu0  ;;  %v888_v62 = vpop.f32.mrf.mxu1  ;;  %v4017_v40 = vsel %vm3576_vm0, 4294967295, %v4016_v40 }
 0x1f8   : > { %2108 = vst [vmem:[%s3285_s30 + $0x190] sm:$0xff] %v1884_v1  ;;  %v1379_v47 = vadd.f32 %v815_v35, %v4011_v50  ;;  %v1380_v7 = vadd.f32 %v888_v62, %v4012_v25  ;;  %v1772_v62 = vsel %vm3571_vm15, 0.0, %v3227_v58  ;;  %v1559_v58 = vand.u32 15, %v1449_v42 }
 0x1fa   : > { %v1691_v32 = vadd.f32 %v3256_v13, %v1379_v47  ;;  %v1788_v12 = vrot.slane %v1380_v7, 1  ;;  %1165 = vmatmul.f32.gmra.mxu1 %v2471_v60  ;;  %1094 = vmatmul.f32.gmra.mxu0 %v2471_v60 }
 0x1fb   : > { %1238 = vmatmul.f32.gmra.mxu2 %v2471_v60  ;;  %1311 = vmatmul.f32.gmra.mxu3 %v2471_v60  ;;  %v4018_v60 = vld [vmem:[#allocation35_spill] sm:$0xff] }
 0x1fc   : > { %v1792_v34 = vsel %vm3917_vm2, %v1787_v0, %v1788_v12  ;;  %v1869_v52 = vadd.f32 %v1772_v62, %v1691_v32  ;;  %vm3599_vm2 = vcmp.eq.s32.totalorder %v1559_v58, 15  ;;  %v4020_v62 = vmov 0 }
 0x1fd   : > { %v1852_v29 = vsel %vm3576_vm0, 0.0, %v1792_v34  ;;  %v4021_v62 = vsel %vm3599_vm2, 4294967295, %v4020_v62  ;;  %v1901_v42 = vadd.f32 %v1691_v32, %v3218_v39  ;;  %vm4025_vm0 = vmmov %vm4023_vm1 }
 0x1fe   : > { %v1885_v1 = vadd.f32 %v1869_v52, %v1380_v7  ;;  %v1916_v8 = vadd.f32 %v1900_v24, %v1852_v29  ;;  %v3590_v35 = vpop.f32.mrf.mxu2  ;;  %v3592_v50 = vpop.f32.mrf.mxu3  ;;  %4022 = vst [vmem:[#allocation28_spill] sm:$0xff] %v4021_v62  ;;  %v2472_v24 = vld [vmem:[%s2875_s23 + $0x58] sm:$0xff]  ;;  %v4024_v29 = vrot.slane %v3278_v53, 1  ;;  %v2473_v53 = vld [vmem:[%s2875_s23 + $0x60] sm:$0xff] }
 0x1ff   : > { %v818_v47 = vpop.f32.mrf.mxu0  ;;  %v891_v25 = vpop.f32.mrf.mxu1 }
 0x200   : > { %2109 = vst [vmem:[%s3285_s30 + $0x1c0] sm:$0xff] %v1885_v1  ;;  %v1382_v49 = vadd.f32 %v818_v47, %v4018_v60  ;;  %v1383_v2 = vadd.f32 %v891_v25, %v4019_v14 }
 0x201   : > { %2124 = vst [vmem:[%s3285_s30 + $0x198] sm:$0xff] %v1916_v8 }
 0x202   : > { %v1692_v0 = vadd.f32 %v3256_v13, %v1382_v49  ;;  %v1789_v7 = vrot.slane %v1383_v2, 1  ;;  %1168 = vmatmul.f32.gmra.mxu1 %v2472_v24  ;;  %1097 = vmatmul.f32.gmra.mxu0 %v2472_v24 }
 0x203   : > { %1241 = vmatmul.f32.gmra.mxu2 %v2472_v24  ;;  %1314 = vmatmul.f32.gmra.mxu3 %v2472_v24 }
 0x204   : > { %v1902_v34 = vadd.f32 %v1692_v0, %v3229_v22  ;;  %v1791_v52 = vsel %vm4023_vm1, %v1788_v12, %v1789_v7  ;;  %v1806_v1 = vsel %vm4025_vm0, %v1789_v7, %v4024_v29  ;;  %v1870_v8 = vadd.f32 %v3238_v6, %v1692_v0  ;;  %v2474_v0 = vld [vmem:[%s2875_s23 + $0x68] sm:$0xff] }
 0x205   : > { %v1854_v39 = vsel %vm3599_vm2, 0.0, %v1806_v1  ;;  %v1917_v32 = vadd.f32 %v1901_v42, %v1791_v52  ;;  %v2475_v52 = vld [vmem:[%s2875_s23 + $0x70] sm:$0xff]  ;;  %vm4032_vm0 = vcmp.lt.s32.totalorder %v3019_v3, 1 }
 0x206   : > { %v1886_v58 = vadd.f32 %v1870_v8, %v1383_v2  ;;  %v1918_v47 = vadd.f32 %v1902_v34, %v1854_v39  ;;  %v3615_v25 = vpop.f32.mrf.mxu2  ;;  %v3617_v22 = vpop.f32.mrf.mxu3  ;;  %vm4033_vm2 = vmmov %vm4032_vm0 }
 0x207   : > { %4026 = vst [vmem:[#allocation21_spill] sm:$0xff] %v3617_v22  ;;  %v894_v12 = vpop.f32.mrf.mxu1  ;;  %v821_v60 = vpop.f32.mrf.mxu0 }
 0x208   : > { %2125 = vst [vmem:[%s3285_s30 + $0x1c8] sm:$0xff] %v1917_v32  ;;  %v2476_v32 = vld [vmem:[%s2875_s23 + $0x78] sm:$0xff]  ;;  %s2176_s23 = sshll.u32 %s3285_s30, 4  ;;  %s2177_s23 = int_to_ptr.vmem [resolvable:$true] %s2176_s23 }
 0x209   : > { %2110 = vst [vmem:[%s3285_s30 + $0x1d0] sm:$0xff] %v1886_v58 }
 0x20a   : > { %2126 = vst [vmem:[%s3285_s30 + $0x1d8] sm:$0xff] %v1918_v47  ;;  %1171 = vmatmul.f32.gmra.mxu1 %v2473_v53  ;;  %1100 = vmatmul.f32.gmra.mxu0 %v2473_v53 }
 0x20b   : > { %1244 = vmatmul.f32.gmra.mxu2 %v2473_v53  ;;  %1317 = vmatmul.f32.gmra.mxu3 %v2473_v53 }
 0x20e   : > { %v967_v6 = vpop.f32.mrf.mxu2  ;;  %v1040_v49 = vpop.f32.mrf.mxu3 }
 0x20f   : > { %v896_v2 = vpop.f32.mrf.mxu1  ;;  %v823_v14 = vpop.f32.mrf.mxu0 }
 0x210   : > { %v4027_v14 = vld [vmem:[#allocation17_spill] sm:$0xff] }
 0x212   : > { %1174 = vmatmul.f32.gmra.mxu1 %v2474_v0  ;;  %1103 = vmatmul.f32.gmra.mxu0 %v2474_v0 }
 0x213   : > { %1247 = vmatmul.f32.gmra.mxu2 %v2474_v0  ;;  %1320 = vmatmul.f32.gmra.mxu3 %v2474_v0 }
 0x216   : > { %v969_v7 = vpop.f32.mrf.mxu2  ;;  %v1042_v24 = vpop.f32.mrf.mxu3 }
 0x217   : > { %v1134_v42 = vpop.f32.mrf.mxu1  ;;  %v1061_v34 = vpop.f32.mrf.mxu0 }
 0x21a   : > { %1177 = vmatmul.f32.gmra.mxu1 %v2475_v52  ;;  %1106 = vmatmul.f32.gmra.mxu0 %v2475_v52 }
 0x21b   : > { %1250 = vmatmul.f32.gmra.mxu2 %v2475_v52  ;;  %1323 = vmatmul.f32.gmra.mxu3 %v2475_v52 }
 0x21e   : > { %v1207_v29 = vpop.f32.mrf.mxu2  ;;  %v1280_v1 = vpop.f32.mrf.mxu3 }
 0x21f   : > { %v1136_v8 = vpop.f32.mrf.mxu1  ;;  %v1063_v39 = vpop.f32.mrf.mxu0  ;;  %v4028_v1 = vld [vmem:[#allocation39_spill] sm:$0xff] }
 0x222   : > { %1180 = vmatmul.f32.gmra.mxu1 %v2476_v32  ;;  %1109 = vmatmul.f32.gmra.mxu0 %v2476_v32 }
 0x223   : > { %1253 = vmatmul.f32.gmra.mxu2 %v2476_v32  ;;  %1326 = vmatmul.f32.gmra.mxu3 %v2476_v32  ;;  %v4029_v32 = vld [vmem:[#allocation38_spill] sm:$0xff] }
 0x226   : > { %v1209_v58 = vpop.f32.mrf.mxu2  ;;  %v1282_v47 = vpop.f32.mrf.mxu3 }
 0x227   : > { %v1138_v12 = vpop.f32.mrf.mxu1  ;;  %v1065_v60 = vpop.f32.mrf.mxu0 }
 0x22a   : > { %1183 = vmatmul.f32.gmra.mxu1 %v2999_v43  ;;  %1112 = vmatmul.f32.gmra.mxu0 %v2999_v43 }
 0x22b   : > { %1256 = vmatmul.f32.gmra.mxu2 %v2999_v43  ;;  %1329 = vmatmul.f32.gmra.mxu3 %v2999_v43 }
 0x22e   : > { %v1211_v53 = vpop.f32.mrf.mxu2  ;;  %v1284_v6 = vpop.f32.mrf.mxu3 }
 0x22f   : > { %v1140_v49 = vpop.f32.mrf.mxu1  ;;  %v1068_v2 = vpop.f32.mrf.mxu0 }
 0x232   : > { %1186 = vmatmul.f32.gmra.mxu1 %v4027_v14  ;;  %1114 = vmatmul.f32.gmra.mxu0 %v4027_v14 }
 0x233   : > { %1259 = vmatmul.f32.gmra.mxu2 %v4027_v14  ;;  %1332 = vmatmul.f32.gmra.mxu3 %v4027_v14 }
 0x236   : > { %v1213_v0 = vpop.f32.mrf.mxu2  ;;  %v1286_v7 = vpop.f32.mrf.mxu3 }
 0x237   : > { %v1142_v24 = vpop.f32.mrf.mxu1  ;;  %v1071_v42 = vpop.f32.mrf.mxu0 }
 0x238   : > { %v3637_v58 = vadd.f32 %v1142_v24, %v4029_v32 }
 0x23e   : > { %v1215_v34 = vpop.f32.mrf.mxu2  ;;  %v1288_v52 = vpop.f32.mrf.mxu3 }
 0x23f   : > { %v1145_v29 = vpop.f32.mrf.mxu1  ;;  %v1074_v43 = vpop.f32.mrf.mxu0  ;;  %v1385_v8 = vadd.f32 %v1215_v34, %v4028_v1  ;;  %v3639_v47 = vadd.f32 %v1288_v52, %v1065_v60 }
 0x240   : > { %v1387_v39 = vadd.f32 %v1145_v29, %v3305_v10  ;;  %v3922_v10 = vrot.slane %v3637_v58, 7 }
 0x241   : > { %4030 = vst [vmem:[#allocation22_spill] sm:$0xff] %v3639_v47  ;;  %v3642_v12 = vadd.f32 %v3256_v13, %v1385_v8  ;;  %v3926_v60 = vrot.slane %v3639_v47, 1 }
 0x242   : > { %v1936_v53 = vrot.slane %v1387_v39, 7 }
 0x243   : > { %4031 = vst [vmem:[#allocation26_spill] sm:$0xff] %v3642_v12  ;;  %v2063_v29 = vadd.f32 %v3642_v12, %v3637_v58 }
 0x246   : > { %v1218_v6 = vpop.f32.mrf.mxu2  ;;  %v1291_v49 = vpop.f32.mrf.mxu3 }
 0x247   : > { %v1388_v14 = vadd.f32 %v1218_v6, %v3307_v61  ;;  %v1389_v0 = vadd.f32 %v1291_v49, %v1068_v2  ;;  %v1148_v7 = vpop.f32.mrf.mxu1  ;;  %v1077_v62 = vpop.f32.mrf.mxu0  ;;  %v1965_v61 = vsel %vm4032_vm0, %v3922_v10, %v1936_v53  ;;  %vm4034_vm0 = vmmov %vm4023_vm1 }
 0x248   : > { %v1390_v24 = vadd.f32 %v1148_v7, %v3334_v41 }
 0x249   : > { %v1920_v34 = vadd.f32 %v3256_v13, %v1388_v14  ;;  %v1984_v52 = vrot.slane %v1389_v0, 1 }
 0x24a   : > { %v1937_v41 = vrot.slane %v1390_v24, 7 }
 0x24b   : > { %v2013_v2 = vsel %vm4023_vm1, %v3926_v60, %v1984_v52  ;;  %v2032_v1 = vadd.f32 %v1965_v61, %v1920_v34  ;;  %v2064_v61 = vadd.f32 %v1920_v34, %v1387_v39  ;;  %vm4037_vm1 = vmmov %vm4034_vm0 }
 0x24c   : > { %v2079_v8 = vadd.f32 %v2063_v29, %v2013_v2  ;;  %v1964_v22 = vsel %vm4033_vm2, %v1936_v53, %v1937_v41 }
 0x24d   : > { %v2048_v32 = vadd.f32 %v2032_v1, %v1389_v0  ;;  %v1969_v29 = vsel %vm3313_vm3, 0.0, %v1964_v22  ;;  %vm4035_vm3 = vmmov %vm4034_vm0 }
 0x24e   : > { %2315 = vst [vmem:[%s3285_s30 + $0x28] sm:$0xff] %v2079_v8  ;;  %v1221_v6 = vpop.f32.mrf.mxu2  ;;  %v1294_v49 = vpop.f32.mrf.mxu3 }
 0x24f   : > { %2300 = vst [vmem:[%s3285_s30 + $0x30] sm:$0xff] %v2048_v32  ;;  %v1391_v14 = vadd.f32 %v1221_v6, %v3336_v45  ;;  %v1392_v7 = vadd.f32 %v1294_v49, %v1071_v42  ;;  %v1151_v10 = vpop.f32.mrf.mxu1  ;;  %v1080_v47 = vpop.f32.mrf.mxu0 }
 0x250   : > { %v1393_v0 = vadd.f32 %v1151_v10, %v3353_v63 }
 0x251   : > { %v1921_v12 = vadd.f32 %v3256_v13, %v1391_v14  ;;  %v1985_v60 = vrot.slane %v1392_v7, 1 }
 0x252   : > { %v1938_v8 = vrot.slane %v1393_v0, 7 }
 0x253   : > { %v2012_v45 = vsel %vm4034_vm0, %v1984_v52, %v1985_v60  ;;  %v2033_v42 = vadd.f32 %v1969_v29, %v1921_v12  ;;  %v2065_v34 = vadd.f32 %v1921_v12, %v1390_v24 }
 0x254   : > { %v2016_v53 = vsel %vm3320_vm4, 0.0, %v2012_v45  ;;  %v1963_v52 = vsel %vm4033_vm2, %v1937_v41, %v1938_v8  ;;  %vm4036_vm4 = vmmov %vm4033_vm2 }
 0x255   : > { %v2049_v2 = vadd.f32 %v2033_v42, %v1392_v7  ;;  %v2080_v1 = vadd.f32 %v2064_v61, %v2016_v53 }
 0x256   : > { %v1224_v32 = vpop.f32.mrf.mxu2  ;;  %v1297_v6 = vpop.f32.mrf.mxu3 }
 0x257   : > { %2301 = vst [vmem:[%s3285_s30 + $0x60] sm:$0xff] %v2049_v2  ;;  %v1394_v37 = vadd.f32 %v1224_v32, %v3355_v20  ;;  %v1395_v22 = vadd.f32 %v1297_v6, %v1074_v43  ;;  %v1154_v49 = vpop.f32.mrf.mxu1  ;;  %v1083_v63 = vpop.f32.mrf.mxu0 }
 0x258   : > { %2316 = vst [vmem:[%s3285_s30 + $0x38] sm:$0xff] %v2080_v1  ;;  %v1396_v39 = vadd.f32 %v1154_v49, %v3379_v55 }
 0x259   : > { %v1922_v10 = vadd.f32 %v3256_v13, %v1394_v37  ;;  %v1986_v27 = vrot.slane %v1395_v22, 1 }
 0x25a   : > { %v1939_v29 = vrot.slane %v1396_v39, 7 }
 0x25b   : > { %v2011_v14 = vsel %vm4035_vm3, %v1985_v60, %v1986_v27  ;;  %v2034_v7 = vadd.f32 %v1963_v52, %v1922_v10  ;;  %v2066_v32 = vadd.f32 %v1922_v10, %v1393_v0 }
 0x25c   : > { %v2081_v20 = vadd.f32 %v2065_v34, %v2011_v14  ;;  %v1962_v12 = vsel %vm4036_vm4, %v1938_v8, %v1939_v29  ;;  %vm4045_vm4 = vmmov %vm4037_vm1 }
 0x25d   : > { %v2050_v43 = vadd.f32 %v2034_v7, %v1395_v22  ;;  %v1971_v2 = vsel %vm3361_vm5, 0.0, %v1962_v12  ;;  %vm4038_vm5 = vmmov %vm4033_vm2 }
 0x25e   : > { %2317 = vst [vmem:[%s3285_s30 + $0x68] sm:$0xff] %v2081_v20  ;;  %v1227_v61 = vpop.f32.mrf.mxu2  ;;  %v1300_v45 = vpop.f32.mrf.mxu3 }
 0x25f   : > { %2302 = vst [vmem:[%s3285_s30 + $0x70] sm:$0xff] %v2050_v43  ;;  %v1397_v55 = vadd.f32 %v1227_v61, %v3381_v57  ;;  %v1398_v42 = vadd.f32 %v1300_v45, %v1077_v62  ;;  %v1157_v24 = vpop.f32.mrf.mxu1  ;;  %v1086_v41 = vpop.f32.mrf.mxu0 }
 0x260   : > { %v1399_v1 = vadd.f32 %v1157_v24, %v3395_v9 }
 0x261   : > { %v1923_v53 = vadd.f32 %v3256_v13, %v1397_v55  ;;  %v1987_v60 = vrot.slane %v1398_v42, 1 }
 0x262   : > { %v1940_v22 = vrot.slane %v1399_v1, 7 }
 0x263   : > { %v2010_v57 = vsel %vm4037_vm1, %v1986_v27, %v1987_v60  ;;  %v2035_v62 = vadd.f32 %v1971_v2, %v1923_v53  ;;  %v2067_v14 = vadd.f32 %v1923_v53, %v1396_v39 }
 0x264   : > { %v2018_v8 = vsel %vm3367_vm6, 0.0, %v2010_v57  ;;  %vm4039_vm6 = vmmov %vm4034_vm0 }
 0x265   : > { %v2051_v6 = vadd.f32 %v2035_v62, %v1398_v42  ;;  %v2082_v37 = vadd.f32 %v2066_v32, %v2018_v8  ;;  %vm4040_vm0 = vmmov %vm4033_vm2 }
 0x266   : > { %v1230_v49 = vpop.f32.mrf.mxu2  ;;  %v1303_v13 = vpop.f32.mrf.mxu3  ;;  %vm4041_vm2 = vmmov %vm4037_vm1 }
 0x267   : > { %2303 = vst [vmem:[%s3285_s30 + $0xa0] sm:$0xff] %v2051_v6  ;;  %v1400_v33 = vadd.f32 %v1230_v49, %v3397_v19  ;;  %v1401_v34 = vadd.f32 %v1303_v13, %v1080_v47  ;;  %v1160_v52 = vpop.f32.mrf.mxu1  ;;  %v1089_v9 = vpop.f32.mrf.mxu0  ;;  %v1961_v19 = vsel %vm4038_vm5, %v1939_v29, %v1940_v22  ;;  %vm4044_vm3 = vmmov %vm4040_vm0 }
 0x268   : > { %2318 = vst [vmem:[%s3285_s30 + $0x78] sm:$0xff] %v2082_v37  ;;  %v1402_v0 = vadd.f32 %v1160_v52, %v3421_v11  ;;  %vm4049_vm5 = vmmov %vm4041_vm2 }
 0x269   : > { %v1924_v10 = vadd.f32 %v3701_v21, %v1400_v33  ;;  %v1988_v27 = vrot.slane %v1401_v34, 1 }
 0x26a   : > { %v1941_v20 = vrot.slane %v1402_v0, 7 }
 0x26b   : > { %v2009_v47 = vsel %vm4039_vm6, %v1987_v60, %v1988_v27  ;;  %v2036_v7 = vadd.f32 %v1961_v19, %v1924_v10  ;;  %v2068_v32 = vadd.f32 %v1924_v10, %v1399_v1  ;;  %vm4053_vm6 = vmmov %vm4040_vm0 }
 0x26c   : > { %v2083_v43 = vadd.f32 %v2067_v14, %v2009_v47  ;;  %v1960_v39 = vsel %vm4040_vm0, %v1940_v22, %v1941_v20 }
 0x26d   : > { %v2052_v61 = vadd.f32 %v2036_v7, %v1401_v34  ;;  %v1973_v60 = vsel %vm3403_vm7, 0.0, %v1960_v39  ;;  %vm4042_vm7 = vmmov %vm4040_vm0 }
 0x26e   : > { %2319 = vst [vmem:[%s3285_s30 + $0xa8] sm:$0xff] %v2083_v43  ;;  %v1233_v11 = vpop.f32.mrf.mxu2  ;;  %v1306_v45 = vpop.f32.mrf.mxu3 }
 0x26f   : > { %2304 = vst [vmem:[%s3285_s30 + $0xb0] sm:$0xff] %v2052_v61  ;;  %v1403_v55 = vadd.f32 %v1233_v11, %v3423_v23  ;;  %v1404_v42 = vadd.f32 %v1306_v45, %v1083_v63  ;;  %v1163_v12 = vpop.f32.mrf.mxu1  ;;  %v1092_v29 = vpop.f32.mrf.mxu0 }
 0x270   : > { %v1405_v2 = vadd.f32 %v1163_v12, %v3437_v56 }
 0x271   : > { %v1925_v24 = vadd.f32 %v3701_v21, %v1403_v55  ;;  %v1989_v53 = vrot.slane %v1404_v42, 1 }
 0x272   : > { %v1942_v6 = vrot.slane %v1405_v2, 7 }
 0x273   : > { %v2008_v23 = vsel %vm4041_vm2, %v1988_v27, %v1989_v53  ;;  %v2037_v63 = vadd.f32 %v1973_v60, %v1925_v24  ;;  %v2069_v34 = vadd.f32 %v1925_v24, %v1402_v0 }
 0x274   : > { %v2020_v57 = vsel %vm3409_vm8, 0.0, %v2008_v23  ;;  %v1959_v52 = vsel %vm4042_vm7, %v1941_v20, %v1942_v6  ;;  %vm4043_vm8 = vmmov %vm4037_vm1 }
 0x275   : > { %v2053_v62 = vadd.f32 %v2037_v63, %v1404_v42  ;;  %v2084_v8 = vadd.f32 %v2068_v32, %v2020_v57 }
 0x276   : > { %v1236_v37 = vpop.f32.mrf.mxu2  ;;  %v1309_v22 = vpop.f32.mrf.mxu3 }
 0x277   : > { %2305 = vst [vmem:[%s3285_s30 + $0xe0] sm:$0xff] %v2053_v62  ;;  %v1406_v36 = vadd.f32 %v1236_v37, %v3439_v4  ;;  %v1407_v49 = vadd.f32 %v1309_v22, %v1086_v41  ;;  %v1166_v13 = vpop.f32.mrf.mxu1  ;;  %v1095_v56 = vpop.f32.mrf.mxu0 }
 0x278   : > { %2320 = vst [vmem:[%s3285_s30 + $0xb8] sm:$0xff] %v2084_v8  ;;  %v1408_v1 = vadd.f32 %v1166_v13, %v3463_v28 }
 0x279   : > { %v1926_v33 = vadd.f32 %v3701_v21, %v1406_v36  ;;  %v1990_v17 = vrot.slane %v1407_v49, 1 }
 0x27a   : > { %v1943_v14 = vrot.slane %v1408_v1, 7 }
 0x27b   : > { %v2007_v10 = vsel %vm4043_vm8, %v1989_v53, %v1990_v17  ;;  %v2038_v27 = vadd.f32 %v1959_v52, %v1926_v33  ;;  %v2070_v42 = vadd.f32 %v1926_v33, %v1405_v2  ;;  %vm4062_vm8 = vnez %v4017_v40  ;;  %v4068_v40 = vld [vmem:[#allocation21_spill] sm:$0xff] }
 0x27c   : > { %v2085_v4 = vadd.f32 %v2069_v34, %v2007_v10  ;;  %v1958_v0 = vsel %vm4044_vm3, %v1942_v6, %v1943_v14 }
 0x27d   : > { %v2054_v41 = vadd.f32 %v2038_v27, %v1407_v49  ;;  %v1975_v45 = vsel %vm3445_vm9, 0.0, %v1958_v0  ;;  %vm4046_vm9 = vmmov %vm4040_vm0 }
 0x27e   : > { %2321 = vst [vmem:[%s3285_s30 + $0xe8] sm:$0xff] %v2085_v4  ;;  %v1239_v19 = vpop.f32.mrf.mxu2  ;;  %v1312_v47 = vpop.f32.mrf.mxu3 }
 0x27f   : > { %2306 = vst [vmem:[%s3285_s30 + $0xf0] sm:$0xff] %v2054_v41  ;;  %v1409_v28 = vadd.f32 %v1239_v19, %v3465_v31  ;;  %v1410_v7 = vadd.f32 %v1312_v47, %v1089_v9  ;;  %v1169_v43 = vpop.f32.mrf.mxu1  ;;  %v1098_v20 = vpop.f32.mrf.mxu0 }
 0x280   : > { %v1411_v55 = vadd.f32 %v1169_v43, %v3479_v26 }
 0x281   : > { %v1927_v61 = vadd.f32 %v3701_v21, %v1409_v28  ;;  %v1991_v11 = vrot.slane %v1410_v7, 1 }
 0x282   : > { %v1944_v53 = vrot.slane %v1411_v55, 7 }
 0x283   : > { %v2006_v31 = vsel %vm4045_vm4, %v1990_v17, %v1991_v11  ;;  %v2039_v9 = vadd.f32 %v1975_v45, %v1927_v61  ;;  %v2071_v62 = vadd.f32 %v1927_v61, %v1408_v1 }
 0x284   : > { %v2022_v39 = vsel %vm3451_vm10, 0.0, %v2006_v31  ;;  %v1957_v8 = vsel %vm4046_vm9, %v1943_v14, %v1944_v53  ;;  %vm4047_vm10 = vmmov %vm4037_vm1 }
 0x285   : > { %v2055_v12 = vadd.f32 %v2039_v9, %v1410_v7  ;;  %v2086_v24 = vadd.f32 %v2070_v42, %v2022_v39  ;;  %vm4048_vm1 = vmmov %vm4040_vm0 }
 0x286   : > { %v1242_v60 = vpop.f32.mrf.mxu2  ;;  %v1315_v32 = vpop.f32.mrf.mxu3  ;;  %vm4064_vm3 = vmmov %vm4048_vm1 }
 0x287   : > { %2307 = vst [vmem:[%s3285_s30 + $0x120] sm:$0xff] %v2055_v12  ;;  %v1412_v54 = vadd.f32 %v1242_v60, %v3481_v38  ;;  %v1413_v23 = vadd.f32 %v1315_v32, %v1092_v29  ;;  %v1172_v63 = vpop.f32.mrf.mxu1  ;;  %v1101_v26 = vpop.f32.mrf.mxu0  ;;  %vm4071_vm4 = vmmov %vm4048_vm1 }
 0x288   : > { %2322 = vst [vmem:[%s3285_s30 + $0xf8] sm:$0xff] %v2086_v24  ;;  %v1414_v2 = vadd.f32 %v1172_v63, %v3505_v18 }
 0x289   : > { %v1928_v57 = vadd.f32 %v3701_v21, %v1412_v54  ;;  %v1992_v15 = vrot.slane %v1413_v23, 1 }
 0x28a   : > { %v1945_v22 = vrot.slane %v1414_v2, 7 }
 0x28b   : > { %v2005_v6 = vsel %vm4047_vm10, %v1991_v11, %v1992_v15  ;;  %v2040_v37 = vadd.f32 %v1957_v8, %v1928_v57  ;;  %v2072_v14 = vadd.f32 %v1928_v57, %v1411_v55 }
 0x28c   : > { %v2087_v38 = vadd.f32 %v2071_v62, %v2005_v6  ;;  %v1956_v1 = vsel %vm4048_vm1, %v1944_v53, %v1945_v22 }
 0x28d   : > { %v2056_v29 = vadd.f32 %v2040_v37, %v1413_v23  ;;  %v1977_v10 = vsel %vm3487_vm11, 0.0, %v1956_v1  ;;  %vm4051_vm11 = vmmov %vm4040_vm0 }
 0x28e   : > { %2323 = vst [vmem:[%s3285_s30 + $0x128] sm:$0xff] %v2087_v38  ;;  %v1245_v36 = vpop.f32.mrf.mxu2  ;;  %v1318_v49 = vpop.f32.mrf.mxu3  ;;  %vm4055_vm0 = vmmov %vm4041_vm2 }
 0x28f   : > { %2308 = vst [vmem:[%s3285_s30 + $0x130] sm:$0xff] %v2056_v29  ;;  %v1415_v18 = vadd.f32 %v1245_v36, %v3507_v44  ;;  %v1416_v13 = vadd.f32 %v1318_v49, %v1095_v56  ;;  %v1175_v33 = vpop.f32.mrf.mxu1  ;;  %v1104_v17 = vpop.f32.mrf.mxu0  ;;  %vm4061_vm7 = vmmov %vm4055_vm0 }
 0x290   : > { %v1417_v27 = vadd.f32 %v1175_v33, %v3521_v48  ;;  %vm4072_vm9 = vmmov %vm4055_vm0 }
 0x291   : > { %v1929_v34 = vadd.f32 %v3701_v21, %v1415_v18  ;;  %v1993_v52 = vrot.slane %v1416_v13, 1  ;;  %vm4074_vm10 = vmmov %vm4055_vm0 }
 0x292   : > { %v1946_v28 = vrot.slane %v1417_v27, 7 }
 0x293   : > { %v2004_v44 = vsel %vm4049_vm5, %v1992_v15, %v1993_v52  ;;  %v2041_v56 = vadd.f32 %v1977_v10, %v1929_v34  ;;  %v2073_v42 = vadd.f32 %v1929_v34, %v1414_v2 }
 0x294   : > { %v2024_v41 = vsel %vm3493_vm12, 0.0, %v2004_v44  ;;  %v1955_v31 = vsel %vm4051_vm11, %v1945_v22, %v1946_v28  ;;  %vm4052_vm12 = vmmov %vm4041_vm2 }
 0x295   : > { %v2057_v19 = vadd.f32 %v2041_v56, %v1416_v13  ;;  %v2088_v47 = vadd.f32 %v2072_v14, %v2024_v41  ;;  %vm4059_vm2 = vmmov %vm4048_vm1 }
 0x296   : > { %v1248_v7 = vpop.f32.mrf.mxu2  ;;  %v1321_v0 = vpop.f32.mrf.mxu3 }
 0x297   : > { %2309 = vst [vmem:[%s3285_s30 + $0x160] sm:$0xff] %v2057_v19  ;;  %v1418_v46 = vadd.f32 %v1248_v7, %v3523_v16  ;;  %v1419_v43 = vadd.f32 %v1321_v0, %v1098_v20  ;;  %v1178_v61 = vpop.f32.mrf.mxu1  ;;  %v1107_v48 = vpop.f32.mrf.mxu0 }
 0x298   : > { %2324 = vst [vmem:[%s3285_s30 + $0x138] sm:$0xff] %v2088_v47  ;;  %v1420_v11 = vadd.f32 %v1178_v61, %v3547_v30 }
 0x299   : > { %v1930_v45 = vadd.f32 %v3701_v21, %v1418_v46  ;;  %v1994_v55 = vrot.slane %v1419_v43, 1 }
 0x29a   : > { %v1947_v12 = vrot.slane %v1420_v11, 7 }
 0x29b   : > { %v2003_v9 = vsel %vm4052_vm12, %v1993_v52, %v1994_v55  ;;  %v2042_v39 = vadd.f32 %v1955_v31, %v1930_v45  ;;  %v2074_v8 = vadd.f32 %v1930_v45, %v1417_v27 }
 0x29c   : > { %v2089_v16 = vadd.f32 %v2073_v42, %v2003_v9  ;;  %v1954_v32 = vsel %vm4053_vm6, %v1946_v28, %v1947_v12 }
 0x29d   : > { %v2058_v20 = vadd.f32 %v2042_v39, %v1419_v43  ;;  %v1979_v15 = vsel %vm3529_vm13, 0.0, %v1954_v32  ;;  %vm4057_vm13 = vmmov %vm4048_vm1 }
 0x29e   : > { %2325 = vst [vmem:[%s3285_s30 + $0x168] sm:$0xff] %v2089_v16  ;;  %v1251_v24 = vpop.f32.mrf.mxu2  ;;  %v1324_v53 = vpop.f32.mrf.mxu3 }
 0x29f   : > { %2310 = vst [vmem:[%s3285_s30 + $0x170] sm:$0xff] %v2058_v20  ;;  %v1421_v30 = vadd.f32 %v1251_v24, %v3549_v5  ;;  %v1422_v60 = vadd.f32 %v1324_v53, %v1101_v26  ;;  %v1181_v54 = vpop.f32.mrf.mxu1  ;;  %v1110_v23 = vpop.f32.mrf.mxu0  ;;  %v4067_v20 = vld [vmem:[#allocation26_spill] sm:$0xff] }
 0x2a0   : > { %v1423_v62 = vadd.f32 %v1181_v54, %v3563_v59 }
 0x2a1   : > { %v1931_v63 = vadd.f32 %v3701_v21, %v1421_v30  ;;  %v1995_v2 = vrot.slane %v1422_v60, 1 }
 0x2a2   : > { %v1948_v29 = vrot.slane %v1423_v62, 7 }
 0x2a3   : > { %v2002_v5 = vsel %vm4055_vm0, %v1994_v55, %v1995_v2  ;;  %v2043_v26 = vadd.f32 %v1979_v15, %v1931_v63  ;;  %v2075_v10 = vadd.f32 %v1931_v63, %v1420_v11 }
 0x2a4   : > { %v2026_v37 = vsel %vm3535_vm14, 0.0, %v2002_v5  ;;  %v1953_v27 = vsel %vm4057_vm13, %v1947_v12, %v1948_v29  ;;  %vm4058_vm14 = vmmov %vm4055_vm0  ;;  %v4065_v12 = vld [vmem:[#allocation37_spill] sm:$0xff] }
 0x2a5   : > { %v2059_v22 = vadd.f32 %v2043_v26, %v1422_v60  ;;  %v2090_v38 = vadd.f32 %v2074_v8, %v2026_v37  ;;  %v4076_v26 = vld [vmem:[#allocation28_spill] sm:$0xff] }
 0x2a6   : > { %v1254_v36 = vpop.f32.mrf.mxu2  ;;  %v1327_v49 = vpop.f32.mrf.mxu3  ;;  %vm4077_vm1 = vnez %v4076_v26 }
 0x2a7   : > { %2311 = vst [vmem:[%s3285_s30 + $0x1a0] sm:$0xff] %v2059_v22  ;;  %v1424_v18 = vadd.f32 %v1254_v36, %v3565_v51  ;;  %v1425_v13 = vadd.f32 %v1327_v49, %v1104_v17  ;;  %v1184_v1 = vpop.f32.mrf.mxu1  ;;  %v1113_v59 = vpop.f32.mrf.mxu0 }
 0x2a8   : > { %2326 = vst [vmem:[%s3285_s30 + $0x178] sm:$0xff] %v2090_v38  ;;  %v1426_v33 = vadd.f32 %v1184_v1, %v3590_v35 }
 0x2a9   : > { %v1932_v34 = vadd.f32 %v3701_v21, %v1424_v18  ;;  %v1996_v52 = vrot.slane %v1425_v13, 1 }
 0x2aa   : > { %v1949_v17 = vrot.slane %v1426_v33, 7 }
 0x2ab   : > { %v2001_v14 = vsel %vm4058_vm14, %v1995_v2, %v1996_v52  ;;  %v2044_v51 = vadd.f32 %v1953_v27, %v1932_v34  ;;  %v2076_v55 = vadd.f32 %v1932_v34, %v1423_v62 }
 0x2ac   : > { %v2091_v44 = vadd.f32 %v2075_v10, %v2001_v14  ;;  %v1952_v47 = vsel %vm4059_vm2, %v1948_v29, %v1949_v17 }
 0x2ad   : > { %v2060_v56 = vadd.f32 %v2044_v51, %v1425_v13  ;;  %v1981_v11 = vsel %vm3571_vm15, 0.0, %v1952_v47  ;;  %vm4066_vm15 = vnez %v4065_v12 }
 0x2ae   : > { %2327 = vst [vmem:[%s3285_s30 + $0x1a8] sm:$0xff] %v2091_v44  ;;  %v1257_v4 = vpop.f32.mrf.mxu2  ;;  %v1330_v41 = vpop.f32.mrf.mxu3 }
 0x2af   : > { %2312 = vst [vmem:[%s3285_s30 + $0x1b0] sm:$0xff] %v2060_v56  ;;  %v1427_v35 = vadd.f32 %v1257_v4, %v3592_v50  ;;  %v1428_v19 = vadd.f32 %v1330_v41, %v1107_v48  ;;  %v1187_v28 = vpop.f32.mrf.mxu1  ;;  %v1115_v7 = vpop.f32.mrf.mxu0 }
 0x2b0   : > { %v1429_v0 = vadd.f32 %v1187_v28, %v3615_v25  ;;  %v4063_v25 = vrot.slane %v3637_v58, 7  ;;  %v4070_v58 = vld [vmem:[#allocation22_spill] sm:$0xff] }
 0x2b1   : > { %v1933_v46 = vadd.f32 %v3701_v21, %v1427_v35  ;;  %v1997_v43 = vrot.slane %v1428_v19, 1  ;;  %v4073_v8 = vrot.slane %v4070_v58, 1 }
 0x2b2   : > { %v1950_v45 = vrot.slane %v1429_v0, 7 }
 0x2b3   : > { %v2000_v50 = vsel %vm4061_vm7, %v1996_v52, %v1997_v43  ;;  %v2045_v48 = vadd.f32 %v1981_v11, %v1933_v46  ;;  %v2077_v57 = vadd.f32 %v1933_v46, %v1426_v33 }
 0x2b4   : > { %v2028_v42 = vsel %vm4062_vm8, 0.0, %v2000_v50  ;;  %v1966_v31 = vsel %vm4064_vm3, %v1950_v45, %v4063_v25  ;;  %v1951_v15 = vsel %vm4071_vm4, %v1949_v17, %v1950_v45 }
 0x2b5   : > { %v2061_v9 = vadd.f32 %v2045_v48, %v1428_v19  ;;  %v2092_v39 = vadd.f32 %v2076_v55, %v2028_v42  ;;  %v1967_v16 = vsel %vm4066_vm15, 0.0, %v1966_v31 }
 0x2b6   : > { %v2031_v24 = vadd.f32 %v1967_v16, %v4067_v20  ;;  %v1260_v53 = vpop.f32.mrf.mxu2  ;;  %v1333_v30 = vpop.f32.mrf.mxu3 }
 0x2b7   : > { %2313 = vst [vmem:[%s3285_s30 + $0x1e0] sm:$0xff] %v2061_v9  ;;  %v1430_v60 = vadd.f32 %v1260_v53, %v4068_v40  ;;  %v1431_v32 = vadd.f32 %v1333_v30, %v1110_v23 }
 0x2b8   : > { %2328 = vst [vmem:[%s3285_s30 + $0x1b8] sm:$0xff] %v2092_v39  ;;  %v2047_v54 = vadd.f32 %v2031_v24, %v4070_v58 }
 0x2b9   : > { %v1934_v63 = vadd.f32 %v3701_v21, %v1430_v60  ;;  %v1998_v2 = vrot.slane %v1431_v32, 1 }
 0x2ba   : > { %2299 = vst [vmem:[%s3285_s30 + $0x20] sm:$0xff] %v2047_v54 }
 0x2bb   : > { %v2078_v23 = vadd.f32 %v1934_v63, %v1429_v0  ;;  %v1999_v62 = vsel %vm4072_vm9, %v1997_v43, %v1998_v2  ;;  %v2014_v21 = vsel %vm4074_vm10, %v1998_v2, %v4073_v8  ;;  %v2046_v5 = vadd.f32 %v1951_v15, %v1934_v63 }
 0x2bc   : > { %v2030_v6 = vsel %vm4077_vm1, 0.0, %v2014_v21  ;;  %v2093_v37 = vadd.f32 %v2077_v57, %v1999_v62 }
 0x2bd   : > { %v2062_v22 = vadd.f32 %v2046_v5, %v1431_v32  ;;  %v2094_v38 = vadd.f32 %v2078_v23, %v2030_v6 }
 0x2be   : > { %2329 = vst [vmem:[%s3285_s30 + $0x1e8] sm:$0xff] %v2093_v37 }
 0x2bf   : > { %2314 = vst [vmem:[%s3285_s30 + $0x1f0] sm:$0xff] %v2062_v22 }
 0x2c0   : > { %2330 = vst [vmem:[%s3285_s30 + $0x1f8] sm:$0xff] %v2094_v38 }
 0x2c1   : > { %2565 = shalt.err (!%p2562_p12)
}
 0x2c2   : > { %s2671_s20 = smov 256   ;;  %s2672_s30 = smov 16  }
 0x2c3   : > { %2347 = dma.vmem_to_hbm [thread:$0]  (%p2763_p6), %s2177_s23, 8192, %s2179_s4, %s2161_s7, %s2671_s20, %s2671_s20, %s2672_s30  }
 0x2c4 PF: > { %s4078_s25 = sld [smem:[#allocation11_spill]]  ;;  %p2364_p13 = scmp.ge.s32.totalorder %s2664_s22, 2 }
 0x2c6   : > { %p2358_p1 = pnand %p2364_p13, %p2769_p10 }
 0x2c8   : > { %p2359_p4 = pneg %p2358_p1 }
 0x2ca   : > { %s2193_s27 = sand.u32 1, %s4078_s25  }
 0x2cb   : > { %s2194_s18 = scalar_lea.sflag [#allocation4], %s2193_s27 }
 0x2cc   : > { %2619 = dma.done.wait (%p2359_p4), %s2194_s18, 8192  }
 0x2cd   : > { %2621 = vsyncadd (%p2359_p4), %s2194_s18, 4294959104  ;;  %s20_s22 = sadd.s32 1, %s2664_s22   ;;  %s4080_s18 = sld [smem:[#allocation12_spill]] }
 0x2ce   : > { %p17_p11 = scmp.ge.s32.totalorder %s20_s22, 6   ;;  %s4081_s20 = sld [smem:[#allocation15_spill]] }
 0x2cf   : > { %s4082_s28 = sld [smem:[#allocation16_spill]]  ;;  %s4083_s12 = smov %s2628_s13 }
 0x2d0   : > { %s4084_s13 = smov %s2632_s14  ;;  %s4085_s14 = smov %s2811_s1 }
 0x2d1   : > { %s4086_s15 = smov %s2640_s16  ;;  %s4087_s16 = smov %s2644_s17 }
 0x2d2   : > { %s4088_s17 = smov %s2808_s9  ;;  %s4089_s19 = smov %s2660_s21 }
 0x2d3   :  { %19 = sbr.rel (!%p17_p11) target bundleno = 13 (0xd), region = 85 }
 0x2d5   : > { %s4090_s21 = smov %s4082_s28 }
 0x2d8   :  { %2200 = vsyncpa [#allocation3], 1 }
 0x2d9   :  { %2202 = vsyncpa [#allocation3 + $0x1], 1 }
 0x2da   :  { %2203 = vsyncpa [#allocation6], 1 }
 0x2db   :  { %2204 = vsyncpa [#allocation4], 1 }
 0x2dc   :  { %2206 = vsyncpa [#allocation4 + $0x1], 1 }

</bundles_post_ra>
